<compile_context>
chip_gen: v7x
topology: tpu7x:2x2x1
jax: 0.10.0
libtpu: 0.0.40
codegen_flags: <defaults>
</compile_context>

<pallas_src>
import functools

import jax
import jax.numpy as jnp
from jax import lax
from jax.experimental import pallas as pl
from jax.experimental.pallas import tpu as pltpu


def _round_up(x, m):
    return ((x + m - 1) // m) * m


def _vq_kernel(x_ref, cbaug_ref, cbt_ref, zq_ref, idx_ref, res_ref):
    """One (batch, L-tile) block of tokens vs. the full (small) codebook set.

    x_ref    : (1, D, TL)       f32   input tile, native Conv1d layout (channels x length)
    cbaug_ref: (NCB, K, D_aug)  f32   [-2*E_c | ||E_c||^2 | 0]   (score matmul LHS)
    cbt_ref  : (NCB, D, K)      f32   codebooks transposed        (one-hot gather LHS)
    zq_ref   : (1, D, TL)       f32   quantized output (sum over codebooks)
    idx_ref  : (1, NCB, TL)     i32   selected code index per codebook (lane-dense)
    res_ref  : (D_aug, TL)      f32   scratch: rows [0:D] = running residual,
                                       rows [D:] = constant 1 (multiplies the ||E||^2 col)
    """
    ncb, k_tokens, _ = cbaug_ref.shape
    d = x_ref.shape[1]
    tl = x_ref.shape[2]
    n_pad = res_ref.shape[0] - d

    # Augmented residual buffer. The constant rows are rewritten every grid step so the
    # kernel stays correct when the grid is sharded across TensorCores (megacore).
    res_ref[:d, :] = x_ref[0]
    res_ref[d:, :] = jnp.ones((n_pad, tl), jnp.float32)

    # Loop-invariant (K, TL) index plane, hoisted out of the per-codebook loop.
    sub_iota = lax.broadcasted_iota(jnp.int32, (k_tokens, tl), 0)

    for c in range(ncb):  # static, small unrolled loop over codebooks
        # dist[k, t] = ||E_c[k]||^2 - 2 <res_t, E_c[k]>   (argmin-equivalent distance)
        dist = jnp.dot(cbaug_ref[c], res_ref[...],
                       preferred_element_type=jnp.float32)              # (K, TL)  MXU

        # Single-pass running (min_val, min_idx) sweep over 8-row sublane chunks.
        # Strict '<' keeps the earlier (smaller) index on exact ties, matching
        # torch.argmin first-occurrence semantics.
        best_d = lax.slice_in_dim(dist, 0, 8, axis=0)                    # (8, TL)
        best_i = lax.slice_in_dim(sub_iota, 0, 8, axis=0)                # (8, TL)
        for kb in range(8, k_tokens, 8):
            d_chunk = lax.slice_in_dim(dist, kb, kb + 8, axis=0)
            i_chunk = lax.slice_in_dim(sub_iota, kb, kb + 8, axis=0)
            take = d_chunk < best_d
            best_d = jnp.where(take, d_chunk, best_d)
            best_i = jnp.where(take, i_chunk, best_i)

        # Resolve the remaining 8 rows with the same first-index tie-break.
        gmin = jnp.min(best_d, axis=0, keepdims=True)                    # (1, TL)
        idx = jnp.min(jnp.where(best_d == gmin, best_i, k_tokens),
                      axis=0, keepdims=True)                             # (1, TL) i32

        # Gather selected codes with a one-hot matmul (stays on the MXU).
        onehot = (sub_iota == idx).astype(jnp.float32)                   # (K, TL)
        q_c = jnp.dot(cbt_ref[c], onehot,
                      preferred_element_type=jnp.float32)                # (D, TL)

        res_ref[:d, :] = res_ref[:d, :] - q_c                            # residual update
        idx_ref[0, c:c + 1, :] = idx                                     # per-row store

    # v_q = sum_c q_c = x - res_final   (no separate accumulator held live)
    zq_ref[0] = (x_ref[0] - res_ref[:d, :]).astype(zq_ref.dtype)


@functools.partial(jax.jit, static_argnames=("tile_l",))
def vq1d_forward(z_e, codebooks, *, tile_l=1024):
    """Forward pass of VQ1D.

    z_e:       (B, token_dim, L) float32   # NCL (PyTorch Conv1d convention)
    codebooks: (num_codebooks, num_tokens, token_dim) float32
    returns {'indices': (B, L, num_codebooks) int32, 'v_q': (B, token_dim, L) f32}
    """
    B, D, L = z_e.shape
    ncb, K, D2 = codebooks.shape
    assert D == D2
    assert D % 8 == 0, "token_dim must be a multiple of 8 for this kernel"
    assert K % 8 == 0 and K >= 8, "num_tokens must be a multiple of 8"

    z_e = z_e.astype(jnp.float32)
    codebooks = codebooks.astype(jnp.float32)

    # Augmented contraction size: D residual rows + 1 row of ones (+ sublane pad).
    d_aug = _round_up(D + 1, 8)

    # Tiny codebook-derived constants (duplicating the small codebooks is ~free):
    #   A_c = [-2*E_c | ||E_c||^2 | 0]  so that  A_c @ [res; 1; ...] = ||E||^2 - 2<res, E>
    cb_sq = jnp.sum(codebooks * codebooks, axis=-1, keepdims=True)       # (ncb, K, 1)
    parts = [-2.0 * codebooks, cb_sq]
    if d_aug > D + 1:
        parts.append(jnp.zeros((ncb, K, d_aug - D - 1), jnp.float32))
    cb_aug = jnp.concatenate(parts, axis=-1)                             # (ncb, K, d_aug)
    cbt = jnp.transpose(codebooks, (0, 2, 1))                            # (ncb, D, K)

    # ---- tile selection along L (no wrapper pad; Pallas masks the ragged last tile) ----
    # Cap TILE_L so ~4 (K, TL) f32 intermediate planes stay well inside v5e's 16 MiB
    # scoped-VMEM default (no-op for small codebooks).
    vmem_cap_tl = max(128, ((12 * 1024 * 1024) // (16 * K)) // 128 * 128)
    tile_l = min(tile_l, vmem_cap_tl)
    if L <= tile_l:
        tl = L                                    # single full-extent tile per batch elem
    else:
        tl = (tile_l // 128) * 128                # lane-aligned tile, ragged tail masked
    n_l = pl.cdiv(L, tl)
    # v7x has 2 TensorCores: keep >= 2 grid points along L when the batch axis cannot
    # provide the parallelism (v5e/v6e single-TC unaffected).
    if B == 1 and n_l == 1 and L > 256:
        tl = _round_up(pl.cdiv(L, 2), 128)
        n_l = pl.cdiv(L, tl)

    grid = (B, n_l)
    flops = 2 * ncb * K * (d_aug + D) * B * L     # two matmuls per codebook per token
    bytes_accessed = 4 * (2 * B * D * L + B * ncb * L) + 4 * (cb_aug.size + cbt.size)

    zq, idx = pl.pallas_call(
        _vq_kernel,
        out_shape=(
            jax.ShapeDtypeStruct((B, D, L), jnp.float32),
            jax.ShapeDtypeStruct((B, ncb, L), jnp.int32),
        ),
        grid_spec=pltpu.PrefetchScalarGridSpec(
            num_scalar_prefetch=0,
            grid=grid,
            in_specs=[
                pl.BlockSpec((1, D, tl), lambda b, i: (b, 0, i)),        # token tile
                pl.BlockSpec((ncb, K, d_aug), lambda b, i: (0, 0, 0)),   # [-2E | ||E||^2]
                pl.BlockSpec((ncb, D, K), lambda b, i: (0, 0, 0)),       # codebooks^T
            ],
            out_specs=[
                pl.BlockSpec((1, D, tl), lambda b, i: (b, 0, i)),        # v_q (NCL)
                pl.BlockSpec((1, ncb, tl), lambda b, i: (b, 0, i)),      # indices
            ],
            scratch_shapes=[pltpu.VMEM((d_aug, tl), jnp.float32)],       # augmented res
        ),
        compiler_params=pltpu.CompilerParams(
            dimension_semantics=("parallel", "parallel")),
        cost_estimate=pl.CostEstimate(
            flops=int(flops), transcendentals=0,
            bytes_accessed=int(bytes_accessed)),
    )(z_e, cb_aug, cbt)

    # v_q already in (B, D, L); only the tiny int32 index tensor needs a transpose.
    indices = jnp.transpose(idx, (0, 2, 1))                              # (B, L, ncb)
    return {"indices": indices, "v_q": zq}


def vq1d_reference(z_e, codebooks):
    """Pure-JAX reference of the residual VQ forward."""
    B, D, L = z_e.shape
    x = jnp.transpose(z_e, (0, 2, 1)).reshape(-1, D)
    res, zq, idxs = x, jnp.zeros_like(x), []
    for c in range(codebooks.shape[0]):
        cb = codebooks[c]
        d = jnp.sum((res[:, None, :] - cb[None, :, :]) ** 2, axis=-1)
        idx = jnp.argmin(d, axis=-1)
        q = cb[idx]
        res = res - q
        zq = zq + q
        idxs.append(idx)
    v_q = jnp.transpose(zq.reshape(B, L, D), (0, 2, 1))
    indices = jnp.stack(idxs, axis=-1).reshape(B, L, -1).astype(jnp.int32)
    return {"indices": indices, "v_q": v_q}


if __name__ == "__main__":
    # Small, deterministic problem: token_dim=32, num_tokens=256, num_codebooks=2
    B, token_dim, L = 2, 32, 16
    num_tokens, num_codebooks = 256, 2

    key = jax.random.PRNGKey(0)
    k_x, k_cb, k_x2 = jax.random.split(key, 3)
    z_e = jax.random.normal(k_x, (B, token_dim, L), dtype=jnp.float32)
    # nn.Parameter(torch.rand(num_tokens, token_dim)) per codebook -> uniform [0, 1)
    codebooks = jax.random.uniform(
        k_cb, (num_codebooks, num_tokens, token_dim), dtype=jnp.float32)

    out = vq1d_forward(z_e, codebooks)
    jax.block_until_ready(out)

    ref = vq1d_reference(z_e, codebooks)
    assert out["v_q"].shape == (B, token_dim, L)
    assert out["indices"].shape == (B, L, num_codebooks)
    assert jnp.array_equal(out["indices"], ref["indices"])
    assert jnp.allclose(out["v_q"], ref["v_q"], atol=1e-5, rtol=1e-5)

    # Second check: multi-tile + ragged-tail path (L % tile_l != 0; no wrapper pad/slice).
    L2 = 640
    z_e2 = jax.random.normal(k_x2, (B, token_dim, L2), dtype=jnp.float32)
    out2 = vq1d_forward(z_e2, codebooks, tile_l=256)
    jax.block_until_ready(out2)
    ref2 = vq1d_reference(z_e2, codebooks)
    assert out2["v_q"].shape == (B, token_dim, L2)
    assert out2["indices"].shape == (B, L2, num_codebooks)
    assert jnp.array_equal(out2["indices"], ref2["indices"])
    assert jnp.allclose(out2["v_q"], ref2["v_q"], atol=1e-5, rtol=1e-5)

    print("KERNEL_OK")
</pallas_src>

<mosaic_0001>
module attributes {stable_mosaic.version = 11 : i64} {
  func.func @_vq_kernel(%arg0: i32, %arg1: i32, %arg2: memref<1x32x16xf32, #tpu.memory_space<vmem>>, %arg3: memref<2x256x40xf32, #tpu.memory_space<vmem>>, %arg4: memref<2x32x256xf32, #tpu.memory_space<vmem>>, %arg5: memref<1x32x16xf32, #tpu.memory_space<vmem>>, %arg6: memref<1x2x16xi32, #tpu.memory_space<vmem>>, %arg7: memref<40x16xf32, #tpu.memory_space<vmem>>) attributes {dimension_semantics = [#tpu.dimension_semantics<parallel>, #tpu.dimension_semantics<parallel>], iteration_bounds = array<i64: 2, 1>, scalar_prefetch = 0 : i64, scratch_operands = 1 : i64, tpu.core_type = #tpu.core_type<tc>, window_params = [{transform_indices = @transform_0, window_bounds = array<i64: 1, 32, 16>}, {pipeline_mode = #tpu.pipeline_mode<synchronous>, transform_indices = @transform_1, window_bounds = array<i64: 2, 256, 40>}, {pipeline_mode = #tpu.pipeline_mode<synchronous>, transform_indices = @transform_2, window_bounds = array<i64: 2, 32, 256>}, {transform_indices = @transform_3, window_bounds = array<i64: 1, 32, 16>}, {transform_indices = @transform_4, window_bounds = array<i64: 1, 2, 16>}]} {
    %c0 = arith.constant 0 : index
    %c0_0 = arith.constant 0 : index
    %c0_1 = arith.constant 0 : index
    %0 = vector.load %arg2[%c0, %c0_0, %c0_1] : memref<1x32x16xf32, #tpu.memory_space<vmem>>, vector<1x32x16xf32>
    %1 = vector.shape_cast %0 : vector<1x32x16xf32> to vector<32x16xf32>
    %c0_2 = arith.constant 0 : index
    %c0_3 = arith.constant 0 : index
    %2 = vector.load %arg7[%c0_2, %c0_3] : memref<40x16xf32, #tpu.memory_space<vmem>>, vector<32x16xf32>
    tpu.vector_store %arg7[%c0_2, %c0_3], %1 {strides = array<i32>} : memref<40x16xf32, #tpu.memory_space<vmem>>, vector<32x16xf32>,
    %cst = arith.constant 1.000000e+00 : f32
    %3 = vector.broadcast %cst : f32 to vector<8x16xf32>
    %c32 = arith.constant 32 : index
    %c0_4 = arith.constant 0 : index
    %4 = vector.load %arg7[%c32, %c0_4] : memref<40x16xf32, #tpu.memory_space<vmem>>, vector<8x16xf32>
    tpu.vector_store %arg7[%c32, %c0_4], %3 {strides = array<i32>} : memref<40x16xf32, #tpu.memory_space<vmem>>, vector<8x16xf32>,
    %5 = tpu.iota {dimensions = array<i32: 0>} : vector<256x16xi32>
    %c0_5 = arith.constant 0 : index
    %c0_6 = arith.constant 0 : index
    %c0_7 = arith.constant 0 : index
    %6 = vector.load %arg3[%c0_5, %c0_6, %c0_7] : memref<2x256x40xf32, #tpu.memory_space<vmem>>, vector<1x256x40xf32>
    %7 = vector.shape_cast %6 : vector<1x256x40xf32> to vector<256x40xf32>
    %c0_8 = arith.constant 0 : index
    %c0_9 = arith.constant 0 : index
    %8 = vector.load %arg7[%c0_8, %c0_9] : memref<40x16xf32, #tpu.memory_space<vmem>>, vector<40x16xf32>
    %cst_10 = arith.constant dense<0.000000e+00> : vector<256x16xf32>
    %9 = tpu.matmul %7, %8, %cst_10 {dimension_numbers = #tpu.dot_dimension_numbers<[1], [0], [0], [1], [0, 0, 1, 1], [], []>} : vector<256x40xf32>, vector<40x16xf32>, vector<256x16xf32> -> vector<256x16xf32>
    %10 = vector.extract_strided_slice %9 {offsets = [0, 0], sizes = [8, 16], strides = [1, 1]} : vector<256x16xf32> to vector<8x16xf32>
    %11 = vector.extract_strided_slice %5 {offsets = [0, 0], sizes = [8, 16], strides = [1, 1]} : vector<256x16xi32> to vector<8x16xi32>
    %12 = vector.extract_strided_slice %9 {offsets = [8, 0], sizes = [8, 16], strides = [1, 1]} : vector<256x16xf32> to vector<8x16xf32>
    %13 = vector.extract_strided_slice %5 {offsets = [8, 0], sizes = [8, 16], strides = [1, 1]} : vector<256x16xi32> to vector<8x16xi32>
    %14 = arith.cmpf olt, %12, %10 : vector<8x16xf32>
    %15 = arith.select %14, %12, %10 : vector<8x16xi1>, vector<8x16xf32>
    %16 = arith.select %14, %13, %11 : vector<8x16xi1>, vector<8x16xi32>
    %17 = vector.extract_strided_slice %9 {offsets = [16, 0], sizes = [8, 16], strides = [1, 1]} : vector<256x16xf32> to vector<8x16xf32>
    %18 = vector.extract_strided_slice %5 {offsets = [16, 0], sizes = [8, 16], strides = [1, 1]} : vector<256x16xi32> to vector<8x16xi32>
    %19 = arith.cmpf olt, %17, %15 : vector<8x16xf32>
    %20 = arith.select %19, %17, %15 : vector<8x16xi1>, vector<8x16xf32>
    %21 = arith.select %19, %18, %16 : vector<8x16xi1>, vector<8x16xi32>
    %22 = vector.extract_strided_slice %9 {offsets = [24, 0], sizes = [8, 16], strides = [1, 1]} : vector<256x16xf32> to vector<8x16xf32>
    %23 = vector.extract_strided_slice %5 {offsets = [24, 0], sizes = [8, 16], strides = [1, 1]} : vector<256x16xi32> to vector<8x16xi32>
    %24 = arith.cmpf olt, %22, %20 : vector<8x16xf32>
    %25 = arith.select %24, %22, %20 : vector<8x16xi1>, vector<8x16xf32>
    %26 = arith.select %24, %23, %21 : vector<8x16xi1>, vector<8x16xi32>
    %27 = vector.extract_strided_slice %9 {offsets = [32, 0], sizes = [8, 16], strides = [1, 1]} : vector<256x16xf32> to vector<8x16xf32>
    %28 = vector.extract_strided_slice %5 {offsets = [32, 0], sizes = [8, 16], strides = [1, 1]} : vector<256x16xi32> to vector<8x16xi32>
    %29 = arith.cmpf olt, %27, %25 : vector<8x16xf32>
    %30 = arith.select %29, %27, %25 : vector<8x16xi1>, vector<8x16xf32>
    %31 = arith.select %29, %28, %26 : vector<8x16xi1>, vector<8x16xi32>
    %32 = vector.extract_strided_slice %9 {offsets = [40, 0], sizes = [8, 16], strides = [1, 1]} : vector<256x16xf32> to vector<8x16xf32>
    %33 = vector.extract_strided_slice %5 {offsets = [40, 0], sizes = [8, 16], strides = [1, 1]} : vector<256x16xi32> to vector<8x16xi32>
    %34 = arith.cmpf olt, %32, %30 : vector<8x16xf32>
    %35 = arith.select %34, %32, %30 : vector<8x16xi1>, vector<8x16xf32>
    %36 = arith.select %34, %33, %31 : vector<8x16xi1>, vector<8x16xi32>
    %37 = vector.extract_strided_slice %9 {offsets = [48, 0], sizes = [8, 16], strides = [1, 1]} : vector<256x16xf32> to vector<8x16xf32>
    %38 = vector.extract_strided_slice %5 {offsets = [48, 0], sizes = [8, 16], strides = [1, 1]} : vector<256x16xi32> to vector<8x16xi32>
    %39 = arith.cmpf olt, %37, %35 : vector<8x16xf32>
    %40 = arith.select %39, %37, %35 : vector<8x16xi1>, vector<8x16xf32>
    %41 = arith.select %39, %38, %36 : vector<8x16xi1>, vector<8x16xi32>
    %42 = vector.extract_strided_slice %9 {offsets = [56, 0], sizes = [8, 16], strides = [1, 1]} : vector<256x16xf32> to vector<8x16xf32>
    %43 = vector.extract_strided_slice %5 {offsets = [56, 0], sizes = [8, 16], strides = [1, 1]} : vector<256x16xi32> to vector<8x16xi32>
    %44 = arith.cmpf olt, %42, %40 : vector<8x16xf32>
    %45 = arith.select %44, %42, %40 : vector<8x16xi1>, vector<8x16xf32>
    %46 = arith.select %44, %43, %41 : vector<8x16xi1>, vector<8x16xi32>
    %47 = vector.extract_strided_slice %9 {offsets = [64, 0], sizes = [8, 16], strides = [1, 1]} : vector<256x16xf32> to vector<8x16xf32>
    %48 = vector.extract_strided_slice %5 {offsets = [64, 0], sizes = [8, 16], strides = [1, 1]} : vector<256x16xi32> to vector<8x16xi32>
    %49 = arith.cmpf olt, %47, %45 : vector<8x16xf32>
    %50 = arith.select %49, %47, %45 : vector<8x16xi1>, vector<8x16xf32>
    %51 = arith.select %49, %48, %46 : vector<8x16xi1>, vector<8x16xi32>
    %52 = vector.extract_strided_slice %9 {offsets = [72, 0], sizes = [8, 16], strides = [1, 1]} : vector<256x16xf32> to vector<8x16xf32>
    %53 = vector.extract_strided_slice %5 {offsets = [72, 0], sizes = [8, 16], strides = [1, 1]} : vector<256x16xi32> to vector<8x16xi32>
    %54 = arith.cmpf olt, %52, %50 : vector<8x16xf32>
    %55 = arith.select %54, %52, %50 : vector<8x16xi1>, vector<8x16xf32>
    %56 = arith.select %54, %53, %51 : vector<8x16xi1>, vector<8x16xi32>
    %57 = vector.extract_strided_slice %9 {offsets = [80, 0], sizes = [8, 16], strides = [1, 1]} : vector<256x16xf32> to vector<8x16xf32>
    %58 = vector.extract_strided_slice %5 {offsets = [80, 0], sizes = [8, 16], strides = [1, 1]} : vector<256x16xi32> to vector<8x16xi32>
    %59 = arith.cmpf olt, %57, %55 : vector<8x16xf32>
    %60 = arith.select %59, %57, %55 : vector<8x16xi1>, vector<8x16xf32>
    %61 = arith.select %59, %58, %56 : vector<8x16xi1>, vector<8x16xi32>
    %62 = vector.extract_strided_slice %9 {offsets = [88, 0], sizes = [8, 16], strides = [1, 1]} : vector<256x16xf32> to vector<8x16xf32>
    %63 = vector.extract_strided_slice %5 {offsets = [88, 0], sizes = [8, 16], strides = [1, 1]} : vector<256x16xi32> to vector<8x16xi32>
    %64 = arith.cmpf olt, %62, %60 : vector<8x16xf32>
    %65 = arith.select %64, %62, %60 : vector<8x16xi1>, vector<8x16xf32>
    %66 = arith.select %64, %63, %61 : vector<8x16xi1>, vector<8x16xi32>
    %67 = vector.extract_strided_slice %9 {offsets = [96, 0], sizes = [8, 16], strides = [1, 1]} : vector<256x16xf32> to vector<8x16xf32>
    %68 = vector.extract_strided_slice %5 {offsets = [96, 0], sizes = [8, 16], strides = [1, 1]} : vector<256x16xi32> to vector<8x16xi32>
    %69 = arith.cmpf olt, %67, %65 : vector<8x16xf32>
    %70 = arith.select %69, %67, %65 : vector<8x16xi1>, vector<8x16xf32>
    %71 = arith.select %69, %68, %66 : vector<8x16xi1>, vector<8x16xi32>
    %72 = vector.extract_strided_slice %9 {offsets = [104, 0], sizes = [8, 16], strides = [1, 1]} : vector<256x16xf32> to vector<8x16xf32>
    %73 = vector.extract_strided_slice %5 {offsets = [104, 0], sizes = [8, 16], strides = [1, 1]} : vector<256x16xi32> to vector<8x16xi32>
    %74 = arith.cmpf olt, %72, %70 : vector<8x16xf32>
    %75 = arith.select %74, %72, %70 : vector<8x16xi1>, vector<8x16xf32>
    %76 = arith.select %74, %73, %71 : vector<8x16xi1>, vector<8x16xi32>
    %77 = vector.extract_strided_slice %9 {offsets = [112, 0], sizes = [8, 16], strides = [1, 1]} : vector<256x16xf32> to vector<8x16xf32>
    %78 = vector.extract_strided_slice %5 {offsets = [112, 0], sizes = [8, 16], strides = [1, 1]} : vector<256x16xi32> to vector<8x16xi32>
    %79 = arith.cmpf olt, %77, %75 : vector<8x16xf32>
    %80 = arith.select %79, %77, %75 : vector<8x16xi1>, vector<8x16xf32>
    %81 = arith.select %79, %78, %76 : vector<8x16xi1>, vector<8x16xi32>
    %82 = vector.extract_strided_slice %9 {offsets = [120, 0], sizes = [8, 16], strides = [1, 1]} : vector<256x16xf32> to vector<8x16xf32>
    %83 = vector.extract_strided_slice %5 {offsets = [120, 0], sizes = [8, 16], strides = [1, 1]} : vector<256x16xi32> to vector<8x16xi32>
    %84 = arith.cmpf olt, %82, %80 : vector<8x16xf32>
    %85 = arith.select %84, %82, %80 : vector<8x16xi1>, vector<8x16xf32>
    %86 = arith.select %84, %83, %81 : vector<8x16xi1>, vector<8x16xi32>
    %87 = vector.extract_strided_slice %9 {offsets = [128, 0], sizes = [8, 16], strides = [1, 1]} : vector<256x16xf32> to vector<8x16xf32>
    %88 = vector.extract_strided_slice %5 {offsets = [128, 0], sizes = [8, 16], strides = [1, 1]} : vector<256x16xi32> to vector<8x16xi32>
    %89 = arith.cmpf olt, %87, %85 : vector<8x16xf32>
    %90 = arith.select %89, %87, %85 : vector<8x16xi1>, vector<8x16xf32>
    %91 = arith.select %89, %88, %86 : vector<8x16xi1>, vector<8x16xi32>
    %92 = vector.extract_strided_slice %9 {offsets = [136, 0], sizes = [8, 16], strides = [1, 1]} : vector<256x16xf32> to vector<8x16xf32>
    %93 = vector.extract_strided_slice %5 {offsets = [136, 0], sizes = [8, 16], strides = [1, 1]} : vector<256x16xi32> to vector<8x16xi32>
    %94 = arith.cmpf olt, %92, %90 : vector<8x16xf32>
    %95 = arith.select %94, %92, %90 : vector<8x16xi1>, vector<8x16xf32>
    %96 = arith.select %94, %93, %91 : vector<8x16xi1>, vector<8x16xi32>
    %97 = vector.extract_strided_slice %9 {offsets = [144, 0], sizes = [8, 16], strides = [1, 1]} : vector<256x16xf32> to vector<8x16xf32>
    %98 = vector.extract_strided_slice %5 {offsets = [144, 0], sizes = [8, 16], strides = [1, 1]} : vector<256x16xi32> to vector<8x16xi32>
    %99 = arith.cmpf olt, %97, %95 : vector<8x16xf32>
    %100 = arith.select %99, %97, %95 : vector<8x16xi1>, vector<8x16xf32>
    %101 = arith.select %99, %98, %96 : vector<8x16xi1>, vector<8x16xi32>
    %102 = vector.extract_strided_slice %9 {offsets = [152, 0], sizes = [8, 16], strides = [1, 1]} : vector<256x16xf32> to vector<8x16xf32>
    %103 = vector.extract_strided_slice %5 {offsets = [152, 0], sizes = [8, 16], strides = [1, 1]} : vector<256x16xi32> to vector<8x16xi32>
    %104 = arith.cmpf olt, %102, %100 : vector<8x16xf32>
    %105 = arith.select %104, %102, %100 : vector<8x16xi1>, vector<8x16xf32>
    %106 = arith.select %104, %103, %101 : vector<8x16xi1>, vector<8x16xi32>
    %107 = vector.extract_strided_slice %9 {offsets = [160, 0], sizes = [8, 16], strides = [1, 1]} : vector<256x16xf32> to vector<8x16xf32>
    %108 = vector.extract_strided_slice %5 {offsets = [160, 0], sizes = [8, 16], strides = [1, 1]} : vector<256x16xi32> to vector<8x16xi32>
    %109 = arith.cmpf olt, %107, %105 : vector<8x16xf32>
    %110 = arith.select %109, %107, %105 : vector<8x16xi1>, vector<8x16xf32>
    %111 = arith.select %109, %108, %106 : vector<8x16xi1>, vector<8x16xi32>
    %112 = vector.extract_strided_slice %9 {offsets = [168, 0], sizes = [8, 16], strides = [1, 1]} : vector<256x16xf32> to vector<8x16xf32>
    %113 = vector.extract_strided_slice %5 {offsets = [168, 0], sizes = [8, 16], strides = [1, 1]} : vector<256x16xi32> to vector<8x16xi32>
    %114 = arith.cmpf olt, %112, %110 : vector<8x16xf32>
    %115 = arith.select %114, %112, %110 : vector<8x16xi1>, vector<8x16xf32>
    %116 = arith.select %114, %113, %111 : vector<8x16xi1>, vector<8x16xi32>
    %117 = vector.extract_strided_slice %9 {offsets = [176, 0], sizes = [8, 16], strides = [1, 1]} : vector<256x16xf32> to vector<8x16xf32>
    %118 = vector.extract_strided_slice %5 {offsets = [176, 0], sizes = [8, 16], strides = [1, 1]} : vector<256x16xi32> to vector<8x16xi32>
    %119 = arith.cmpf olt, %117, %115 : vector<8x16xf32>
    %120 = arith.select %119, %117, %115 : vector<8x16xi1>, vector<8x16xf32>
    %121 = arith.select %119, %118, %116 : vector<8x16xi1>, vector<8x16xi32>
    %122 = vector.extract_strided_slice %9 {offsets = [184, 0], sizes = [8, 16], strides = [1, 1]} : vector<256x16xf32> to vector<8x16xf32>
    %123 = vector.extract_strided_slice %5 {offsets = [184, 0], sizes = [8, 16], strides = [1, 1]} : vector<256x16xi32> to vector<8x16xi32>
    %124 = arith.cmpf olt, %122, %120 : vector<8x16xf32>
    %125 = arith.select %124, %122, %120 : vector<8x16xi1>, vector<8x16xf32>
    %126 = arith.select %124, %123, %121 : vector<8x16xi1>, vector<8x16xi32>
    %127 = vector.extract_strided_slice %9 {offsets = [192, 0], sizes = [8, 16], strides = [1, 1]} : vector<256x16xf32> to vector<8x16xf32>
    %128 = vector.extract_strided_slice %5 {offsets = [192, 0], sizes = [8, 16], strides = [1, 1]} : vector<256x16xi32> to vector<8x16xi32>
    %129 = arith.cmpf olt, %127, %125 : vector<8x16xf32>
    %130 = arith.select %129, %127, %125 : vector<8x16xi1>, vector<8x16xf32>
    %131 = arith.select %129, %128, %126 : vector<8x16xi1>, vector<8x16xi32>
    %132 = vector.extract_strided_slice %9 {offsets = [200, 0], sizes = [8, 16], strides = [1, 1]} : vector<256x16xf32> to vector<8x16xf32>
    %133 = vector.extract_strided_slice %5 {offsets = [200, 0], sizes = [8, 16], strides = [1, 1]} : vector<256x16xi32> to vector<8x16xi32>
    %134 = arith.cmpf olt, %132, %130 : vector<8x16xf32>
    %135 = arith.select %134, %132, %130 : vector<8x16xi1>, vector<8x16xf32>
    %136 = arith.select %134, %133, %131 : vector<8x16xi1>, vector<8x16xi32>
    %137 = vector.extract_strided_slice %9 {offsets = [208, 0], sizes = [8, 16], strides = [1, 1]} : vector<256x16xf32> to vector<8x16xf32>
    %138 = vector.extract_strided_slice %5 {offsets = [208, 0], sizes = [8, 16], strides = [1, 1]} : vector<256x16xi32> to vector<8x16xi32>
    %139 = arith.cmpf olt, %137, %135 : vector<8x16xf32>
    %140 = arith.select %139, %137, %135 : vector<8x16xi1>, vector<8x16xf32>
    %141 = arith.select %139, %138, %136 : vector<8x16xi1>, vector<8x16xi32>
    %142 = vector.extract_strided_slice %9 {offsets = [216, 0], sizes = [8, 16], strides = [1, 1]} : vector<256x16xf32> to vector<8x16xf32>
    %143 = vector.extract_strided_slice %5 {offsets = [216, 0], sizes = [8, 16], strides = [1, 1]} : vector<256x16xi32> to vector<8x16xi32>
    %144 = arith.cmpf olt, %142, %140 : vector<8x16xf32>
    %145 = arith.select %144, %142, %140 : vector<8x16xi1>, vector<8x16xf32>
    %146 = arith.select %144, %143, %141 : vector<8x16xi1>, vector<8x16xi32>
    %147 = vector.extract_strided_slice %9 {offsets = [224, 0], sizes = [8, 16], strides = [1, 1]} : vector<256x16xf32> to vector<8x16xf32>
    %148 = vector.extract_strided_slice %5 {offsets = [224, 0], sizes = [8, 16], strides = [1, 1]} : vector<256x16xi32> to vector<8x16xi32>
    %149 = arith.cmpf olt, %147, %145 : vector<8x16xf32>
    %150 = arith.select %149, %147, %145 : vector<8x16xi1>, vector<8x16xf32>
    %151 = arith.select %149, %148, %146 : vector<8x16xi1>, vector<8x16xi32>
    %152 = vector.extract_strided_slice %9 {offsets = [232, 0], sizes = [8, 16], strides = [1, 1]} : vector<256x16xf32> to vector<8x16xf32>
    %153 = vector.extract_strided_slice %5 {offsets = [232, 0], sizes = [8, 16], strides = [1, 1]} : vector<256x16xi32> to vector<8x16xi32>
    %154 = arith.cmpf olt, %152, %150 : vector<8x16xf32>
    %155 = arith.select %154, %152, %150 : vector<8x16xi1>, vector<8x16xf32>
    %156 = arith.select %154, %153, %151 : vector<8x16xi1>, vector<8x16xi32>
    %157 = vector.extract_strided_slice %9 {offsets = [240, 0], sizes = [8, 16], strides = [1, 1]} : vector<256x16xf32> to vector<8x16xf32>
    %158 = vector.extract_strided_slice %5 {offsets = [240, 0], sizes = [8, 16], strides = [1, 1]} : vector<256x16xi32> to vector<8x16xi32>
    %159 = arith.cmpf olt, %157, %155 : vector<8x16xf32>
    %160 = arith.select %159, %157, %155 : vector<8x16xi1>, vector<8x16xf32>
    %161 = arith.select %159, %158, %156 : vector<8x16xi1>, vector<8x16xi32>
    %162 = vector.extract_strided_slice %9 {offsets = [248, 0], sizes = [8, 16], strides = [1, 1]} : vector<256x16xf32> to vector<8x16xf32>
    %163 = vector.extract_strided_slice %5 {offsets = [248, 0], sizes = [8, 16], strides = [1, 1]} : vector<256x16xi32> to vector<8x16xi32>
    %164 = arith.cmpf olt, %162, %160 : vector<8x16xf32>
    %165 = arith.select %164, %162, %160 : vector<8x16xi1>, vector<8x16xf32>
    %166 = arith.select %164, %163, %161 : vector<8x16xi1>, vector<8x16xi32>
    %cst_11 = arith.constant dense<0x7F800000> : vector<16xf32>
    %167 = vector.multi_reduction <minimumf>, %165, %cst_11 [0] : vector<8x16xf32> to vector<16xf32>
    %168 = vector.shape_cast %167 : vector<16xf32> to vector<1x16xf32>
    %169 = vector.broadcast %168 : vector<1x16xf32> to vector<8x16xf32>
    %170 = arith.cmpf oeq, %165, %169 : vector<8x16xf32>
    %c256_i32 = arith.constant 256 : i32
    %171 = vector.broadcast %c256_i32 : i32 to vector<8x16xi32>
    %172 = arith.select %170, %166, %171 : vector<8x16xi1>, vector<8x16xi32>
    %cst_12 = arith.constant dense<2147483647> : vector<16xi32>
    %173 = vector.multi_reduction <minsi>, %172, %cst_12 [0] : vector<8x16xi32> to vector<16xi32>
    %174 = vector.shape_cast %173 : vector<16xi32> to vector<1x16xi32>
    %175 = vector.broadcast %174 : vector<1x16xi32> to vector<256x16xi32>
    %176 = arith.cmpi eq, %5, %175 : vector<256x16xi32>
    %177 = arith.extui %176 : vector<256x16xi1> to vector<256x16xi32>
    %178 = arith.sitofp %177 : vector<256x16xi32> to vector<256x16xf32>
    %c0_13 = arith.constant 0 : index
    %c0_14 = arith.constant 0 : index
    %c0_15 = arith.constant 0 : index
    %179 = vector.load %arg4[%c0_13, %c0_14, %c0_15] : memref<2x32x256xf32, #tpu.memory_space<vmem>>, vector<1x32x256xf32>
    %180 = vector.shape_cast %179 : vector<1x32x256xf32> to vector<32x256xf32>
    %cst_16 = arith.constant dense<0.000000e+00> : vector<32x16xf32>
    %181 = tpu.matmul %180, %178, %cst_16 {dimension_numbers = #tpu.dot_dimension_numbers<[1], [0], [0], [1], [0, 0, 1, 1], [], []>} : vector<32x256xf32>, vector<256x16xf32>, vector<32x16xf32> -> vector<32x16xf32>
    %c0_17 = arith.constant 0 : index
    %c0_18 = arith.constant 0 : index
    %182 = vector.load %arg7[%c0_17, %c0_18] : memref<40x16xf32, #tpu.memory_space<vmem>>, vector<32x16xf32>
    %183 = arith.subf %182, %181 : vector<32x16xf32>
    %c0_19 = arith.constant 0 : index
    %c0_20 = arith.constant 0 : index
    %184 = vector.load %arg7[%c0_19, %c0_20] : memref<40x16xf32, #tpu.memory_space<vmem>>, vector<32x16xf32>
    tpu.vector_store %arg7[%c0_19, %c0_20], %183 {strides = array<i32>} : memref<40x16xf32, #tpu.memory_space<vmem>>, vector<32x16xf32>,
    %c0_21 = arith.constant 0 : index
    %c0_22 = arith.constant 0 : index
    %c0_23 = arith.constant 0 : index
    %185 = vector.load %arg6[%c0_21, %c0_22, %c0_23] : memref<1x2x16xi32, #tpu.memory_space<vmem>>, vector<1x1x16xi32>
    %186 = vector.shape_cast %185 : vector<1x1x16xi32> to vector<1x16xi32>
    %187 = vector.shape_cast %174 : vector<1x16xi32> to vector<1x1x16xi32>
    tpu.vector_store %arg6[%c0_21, %c0_22, %c0_23], %187 {strides = array<i32>} : memref<1x2x16xi32, #tpu.memory_space<vmem>>, vector<1x1x16xi32>,
    %c1 = arith.constant 1 : index
    %c0_24 = arith.constant 0 : index
    %c0_25 = arith.constant 0 : index
    %188 = vector.load %arg3[%c1, %c0_24, %c0_25] : memref<2x256x40xf32, #tpu.memory_space<vmem>>, vector<1x256x40xf32>
    %189 = vector.shape_cast %188 : vector<1x256x40xf32> to vector<256x40xf32>
    %c0_26 = arith.constant 0 : index
    %c0_27 = arith.constant 0 : index
    %190 = vector.load %arg7[%c0_26, %c0_27] : memref<40x16xf32, #tpu.memory_space<vmem>>, vector<40x16xf32>
    %cst_28 = arith.constant dense<0.000000e+00> : vector<256x16xf32>
    %191 = tpu.matmul %189, %190, %cst_28 {dimension_numbers = #tpu.dot_dimension_numbers<[1], [0], [0], [1], [0, 0, 1, 1], [], []>} : vector<256x40xf32>, vector<40x16xf32>, vector<256x16xf32> -> vector<256x16xf32>
    %192 = vector.extract_strided_slice %191 {offsets = [0, 0], sizes = [8, 16], strides = [1, 1]} : vector<256x16xf32> to vector<8x16xf32>
    %193 = vector.extract_strided_slice %5 {offsets = [0, 0], sizes = [8, 16], strides = [1, 1]} : vector<256x16xi32> to vector<8x16xi32>
    %194 = vector.extract_strided_slice %191 {offsets = [8, 0], sizes = [8, 16], strides = [1, 1]} : vector<256x16xf32> to vector<8x16xf32>
    %195 = vector.extract_strided_slice %5 {offsets = [8, 0], sizes = [8, 16], strides = [1, 1]} : vector<256x16xi32> to vector<8x16xi32>
    %196 = arith.cmpf olt, %194, %192 : vector<8x16xf32>
    %197 = arith.select %196, %194, %192 : vector<8x16xi1>, vector<8x16xf32>
    %198 = arith.select %196, %195, %193 : vector<8x16xi1>, vector<8x16xi32>
    %199 = vector.extract_strided_slice %191 {offsets = [16, 0], sizes = [8, 16], strides = [1, 1]} : vector<256x16xf32> to vector<8x16xf32>
    %200 = vector.extract_strided_slice %5 {offsets = [16, 0], sizes = [8, 16], strides = [1, 1]} : vector<256x16xi32> to vector<8x16xi32>
    %201 = arith.cmpf olt, %199, %197 : vector<8x16xf32>
    %202 = arith.select %201, %199, %197 : vector<8x16xi1>, vector<8x16xf32>
    %203 = arith.select %201, %200, %198 : vector<8x16xi1>, vector<8x16xi32>
    %204 = vector.extract_strided_slice %191 {offsets = [24, 0], sizes = [8, 16], strides = [1, 1]} : vector<256x16xf32> to vector<8x16xf32>
    %205 = vector.extract_strided_slice %5 {offsets = [24, 0], sizes = [8, 16], strides = [1, 1]} : vector<256x16xi32> to vector<8x16xi32>
    %206 = arith.cmpf olt, %204, %202 : vector<8x16xf32>
    %207 = arith.select %206, %204, %202 : vector<8x16xi1>, vector<8x16xf32>
    %208 = arith.select %206, %205, %203 : vector<8x16xi1>, vector<8x16xi32>
    %209 = vector.extract_strided_slice %191 {offsets = [32, 0], sizes = [8, 16], strides = [1, 1]} : vector<256x16xf32> to vector<8x16xf32>
    %210 = vector.extract_strided_slice %5 {offsets = [32, 0], sizes = [8, 16], strides = [1, 1]} : vector<256x16xi32> to vector<8x16xi32>
    %211 = arith.cmpf olt, %209, %207 : vector<8x16xf32>
    %212 = arith.select %211, %209, %207 : vector<8x16xi1>, vector<8x16xf32>
    %213 = arith.select %211, %210, %208 : vector<8x16xi1>, vector<8x16xi32>
    %214 = vector.extract_strided_slice %191 {offsets = [40, 0], sizes = [8, 16], strides = [1, 1]} : vector<256x16xf32> to vector<8x16xf32>
    %215 = vector.extract_strided_slice %5 {offsets = [40, 0], sizes = [8, 16], strides = [1, 1]} : vector<256x16xi32> to vector<8x16xi32>
    %216 = arith.cmpf olt, %214, %212 : vector<8x16xf32>
    %217 = arith.select %216, %214, %212 : vector<8x16xi1>, vector<8x16xf32>
    %218 = arith.select %216, %215, %213 : vector<8x16xi1>, vector<8x16xi32>
    %219 = vector.extract_strided_slice %191 {offsets = [48, 0], sizes = [8, 16], strides = [1, 1]} : vector<256x16xf32> to vector<8x16xf32>
    %220 = vector.extract_strided_slice %5 {offsets = [48, 0], sizes = [8, 16], strides = [1, 1]} : vector<256x16xi32> to vector<8x16xi32>
    %221 = arith.cmpf olt, %219, %217 : vector<8x16xf32>
    %222 = arith.select %221, %219, %217 : vector<8x16xi1>, vector<8x16xf32>
    %223 = arith.select %221, %220, %218 : vector<8x16xi1>, vector<8x16xi32>
    %224 = vector.extract_strided_slice %191 {offsets = [56, 0], sizes = [8, 16], strides = [1, 1]} : vector<256x16xf32> to vector<8x16xf32>
    %225 = vector.extract_strided_slice %5 {offsets = [56, 0], sizes = [8, 16], strides = [1, 1]} : vector<256x16xi32> to vector<8x16xi32>
    %226 = arith.cmpf olt, %224, %222 : vector<8x16xf32>
    %227 = arith.select %226, %224, %222 : vector<8x16xi1>, vector<8x16xf32>
    %228 = arith.select %226, %225, %223 : vector<8x16xi1>, vector<8x16xi32>
    %229 = vector.extract_strided_slice %191 {offsets = [64, 0], sizes = [8, 16], strides = [1, 1]} : vector<256x16xf32> to vector<8x16xf32>
    %230 = vector.extract_strided_slice %5 {offsets = [64, 0], sizes = [8, 16], strides = [1, 1]} : vector<256x16xi32> to vector<8x16xi32>
    %231 = arith.cmpf olt, %229, %227 : vector<8x16xf32>
    %232 = arith.select %231, %229, %227 : vector<8x16xi1>, vector<8x16xf32>
    %233 = arith.select %231, %230, %228 : vector<8x16xi1>, vector<8x16xi32>
    %234 = vector.extract_strided_slice %191 {offsets = [72, 0], sizes = [8, 16], strides = [1, 1]} : vector<256x16xf32> to vector<8x16xf32>
    %235 = vector.extract_strided_slice %5 {offsets = [72, 0], sizes = [8, 16], strides = [1, 1]} : vector<256x16xi32> to vector<8x16xi32>
    %236 = arith.cmpf olt, %234, %232 : vector<8x16xf32>
    %237 = arith.select %236, %234, %232 : vector<8x16xi1>, vector<8x16xf32>
    %238 = arith.select %236, %235, %233 : vector<8x16xi1>, vector<8x16xi32>
    %239 = vector.extract_strided_slice %191 {offsets = [80, 0], sizes = [8, 16], strides = [1, 1]} : vector<256x16xf32> to vector<8x16xf32>
    %240 = vector.extract_strided_slice %5 {offsets = [80, 0], sizes = [8, 16], strides = [1, 1]} : vector<256x16xi32> to vector<8x16xi32>
    %241 = arith.cmpf olt, %239, %237 : vector<8x16xf32>
    %242 = arith.select %241, %239, %237 : vector<8x16xi1>, vector<8x16xf32>
    %243 = arith.select %241, %240, %238 : vector<8x16xi1>, vector<8x16xi32>
    %244 = vector.extract_strided_slice %191 {offsets = [88, 0], sizes = [8, 16], strides = [1, 1]} : vector<256x16xf32> to vector<8x16xf32>
    %245 = vector.extract_strided_slice %5 {offsets = [88, 0], sizes = [8, 16], strides = [1, 1]} : vector<256x16xi32> to vector<8x16xi32>
    %246 = arith.cmpf olt, %244, %242 : vector<8x16xf32>
    %247 = arith.select %246, %244, %242 : vector<8x16xi1>, vector<8x16xf32>
    %248 = arith.select %246, %245, %243 : vector<8x16xi1>, vector<8x16xi32>
    %249 = vector.extract_strided_slice %191 {offsets = [96, 0], sizes = [8, 16], strides = [1, 1]} : vector<256x16xf32> to vector<8x16xf32>
    %250 = vector.extract_strided_slice %5 {offsets = [96, 0], sizes = [8, 16], strides = [1, 1]} : vector<256x16xi32> to vector<8x16xi32>
    %251 = arith.cmpf olt, %249, %247 : vector<8x16xf32>
    %252 = arith.select %251, %249, %247 : vector<8x16xi1>, vector<8x16xf32>
    %253 = arith.select %251, %250, %248 : vector<8x16xi1>, vector<8x16xi32>
    %254 = vector.extract_strided_slice %191 {offsets = [104, 0], sizes = [8, 16], strides = [1, 1]} : vector<256x16xf32> to vector<8x16xf32>
    %255 = vector.extract_strided_slice %5 {offsets = [104, 0], sizes = [8, 16], strides = [1, 1]} : vector<256x16xi32> to vector<8x16xi32>
    %256 = arith.cmpf olt, %254, %252 : vector<8x16xf32>
    %257 = arith.select %256, %254, %252 : vector<8x16xi1>, vector<8x16xf32>
    %258 = arith.select %256, %255, %253 : vector<8x16xi1>, vector<8x16xi32>
    %259 = vector.extract_strided_slice %191 {offsets = [112, 0], sizes = [8, 16], strides = [1, 1]} : vector<256x16xf32> to vector<8x16xf32>
    %260 = vector.extract_strided_slice %5 {offsets = [112, 0], sizes = [8, 16], strides = [1, 1]} : vector<256x16xi32> to vector<8x16xi32>
    %261 = arith.cmpf olt, %259, %257 : vector<8x16xf32>
    %262 = arith.select %261, %259, %257 : vector<8x16xi1>, vector<8x16xf32>
    %263 = arith.select %261, %260, %258 : vector<8x16xi1>, vector<8x16xi32>
    %264 = vector.extract_strided_slice %191 {offsets = [120, 0], sizes = [8, 16], strides = [1, 1]} : vector<256x16xf32> to vector<8x16xf32>
    %265 = vector.extract_strided_slice %5 {offsets = [120, 0], sizes = [8, 16], strides = [1, 1]} : vector<256x16xi32> to vector<8x16xi32>
    %266 = arith.cmpf olt, %264, %262 : vector<8x16xf32>
    %267 = arith.select %266, %264, %262 : vector<8x16xi1>, vector<8x16xf32>
    %268 = arith.select %266, %265, %263 : vector<8x16xi1>, vector<8x16xi32>
    %269 = vector.extract_strided_slice %191 {offsets = [128, 0], sizes = [8, 16], strides = [1, 1]} : vector<256x16xf32> to vector<8x16xf32>
    %270 = vector.extract_strided_slice %5 {offsets = [128, 0], sizes = [8, 16], strides = [1, 1]} : vector<256x16xi32> to vector<8x16xi32>
    %271 = arith.cmpf olt, %269, %267 : vector<8x16xf32>
    %272 = arith.select %271, %269, %267 : vector<8x16xi1>, vector<8x16xf32>
    %273 = arith.select %271, %270, %268 : vector<8x16xi1>, vector<8x16xi32>
    %274 = vector.extract_strided_slice %191 {offsets = [136, 0], sizes = [8, 16], strides = [1, 1]} : vector<256x16xf32> to vector<8x16xf32>
    %275 = vector.extract_strided_slice %5 {offsets = [136, 0], sizes = [8, 16], strides = [1, 1]} : vector<256x16xi32> to vector<8x16xi32>
    %276 = arith.cmpf olt, %274, %272 : vector<8x16xf32>
    %277 = arith.select %276, %274, %272 : vector<8x16xi1>, vector<8x16xf32>
    %278 = arith.select %276, %275, %273 : vector<8x16xi1>, vector<8x16xi32>
    %279 = vector.extract_strided_slice %191 {offsets = [144, 0], sizes = [8, 16], strides = [1, 1]} : vector<256x16xf32> to vector<8x16xf32>
    %280 = vector.extract_strided_slice %5 {offsets = [144, 0], sizes = [8, 16], strides = [1, 1]} : vector<256x16xi32> to vector<8x16xi32>
    %281 = arith.cmpf olt, %279, %277 : vector<8x16xf32>
    %282 = arith.select %281, %279, %277 : vector<8x16xi1>, vector<8x16xf32>
    %283 = arith.select %281, %280, %278 : vector<8x16xi1>, vector<8x16xi32>
    %284 = vector.extract_strided_slice %191 {offsets = [152, 0], sizes = [8, 16], strides = [1, 1]} : vector<256x16xf32> to vector<8x16xf32>
    %285 = vector.extract_strided_slice %5 {offsets = [152, 0], sizes = [8, 16], strides = [1, 1]} : vector<256x16xi32> to vector<8x16xi32>
    %286 = arith.cmpf olt, %284, %282 : vector<8x16xf32>
    %287 = arith.select %286, %284, %282 : vector<8x16xi1>, vector<8x16xf32>
    %288 = arith.select %286, %285, %283 : vector<8x16xi1>, vector<8x16xi32>
    %289 = vector.extract_strided_slice %191 {offsets = [160, 0], sizes = [8, 16], strides = [1, 1]} : vector<256x16xf32> to vector<8x16xf32>
    %290 = vector.extract_strided_slice %5 {offsets = [160, 0], sizes = [8, 16], strides = [1, 1]} : vector<256x16xi32> to vector<8x16xi32>
    %291 = arith.cmpf olt, %289, %287 : vector<8x16xf32>
    %292 = arith.select %291, %289, %287 : vector<8x16xi1>, vector<8x16xf32>
    %293 = arith.select %291, %290, %288 : vector<8x16xi1>, vector<8x16xi32>
    %294 = vector.extract_strided_slice %191 {offsets = [168, 0], sizes = [8, 16], strides = [1, 1]} : vector<256x16xf32> to vector<8x16xf32>
    %295 = vector.extract_strided_slice %5 {offsets = [168, 0], sizes = [8, 16], strides = [1, 1]} : vector<256x16xi32> to vector<8x16xi32>
    %296 = arith.cmpf olt, %294, %292 : vector<8x16xf32>
    %297 = arith.select %296, %294, %292 : vector<8x16xi1>, vector<8x16xf32>
    %298 = arith.select %296, %295, %293 : vector<8x16xi1>, vector<8x16xi32>
    %299 = vector.extract_strided_slice %191 {offsets = [176, 0], sizes = [8, 16], strides = [1, 1]} : vector<256x16xf32> to vector<8x16xf32>
    %300 = vector.extract_strided_slice %5 {offsets = [176, 0], sizes = [8, 16], strides = [1, 1]} : vector<256x16xi32> to vector<8x16xi32>
    %301 = arith.cmpf olt, %299, %297 : vector<8x16xf32>
    %302 = arith.select %301, %299, %297 : vector<8x16xi1>, vector<8x16xf32>
    %303 = arith.select %301, %300, %298 : vector<8x16xi1>, vector<8x16xi32>
    %304 = vector.extract_strided_slice %191 {offsets = [184, 0], sizes = [8, 16], strides = [1, 1]} : vector<256x16xf32> to vector<8x16xf32>
    %305 = vector.extract_strided_slice %5 {offsets = [184, 0], sizes = [8, 16], strides = [1, 1]} : vector<256x16xi32> to vector<8x16xi32>
    %306 = arith.cmpf olt, %304, %302 : vector<8x16xf32>
    %307 = arith.select %306, %304, %302 : vector<8x16xi1>, vector<8x16xf32>
    %308 = arith.select %306, %305, %303 : vector<8x16xi1>, vector<8x16xi32>
    %309 = vector.extract_strided_slice %191 {offsets = [192, 0], sizes = [8, 16], strides = [1, 1]} : vector<256x16xf32> to vector<8x16xf32>
    %310 = vector.extract_strided_slice %5 {offsets = [192, 0], sizes = [8, 16], strides = [1, 1]} : vector<256x16xi32> to vector<8x16xi32>
    %311 = arith.cmpf olt, %309, %307 : vector<8x16xf32>
    %312 = arith.select %311, %309, %307 : vector<8x16xi1>, vector<8x16xf32>
    %313 = arith.select %311, %310, %308 : vector<8x16xi1>, vector<8x16xi32>
    %314 = vector.extract_strided_slice %191 {offsets = [200, 0], sizes = [8, 16], strides = [1, 1]} : vector<256x16xf32> to vector<8x16xf32>
    %315 = vector.extract_strided_slice %5 {offsets = [200, 0], sizes = [8, 16], strides = [1, 1]} : vector<256x16xi32> to vector<8x16xi32>
    %316 = arith.cmpf olt, %314, %312 : vector<8x16xf32>
    %317 = arith.select %316, %314, %312 : vector<8x16xi1>, vector<8x16xf32>
    %318 = arith.select %316, %315, %313 : vector<8x16xi1>, vector<8x16xi32>
    %319 = vector.extract_strided_slice %191 {offsets = [208, 0], sizes = [8, 16], strides = [1, 1]} : vector<256x16xf32> to vector<8x16xf32>
    %320 = vector.extract_strided_slice %5 {offsets = [208, 0], sizes = [8, 16], strides = [1, 1]} : vector<256x16xi32> to vector<8x16xi32>
    %321 = arith.cmpf olt, %319, %317 : vector<8x16xf32>
    %322 = arith.select %321, %319, %317 : vector<8x16xi1>, vector<8x16xf32>
    %323 = arith.select %321, %320, %318 : vector<8x16xi1>, vector<8x16xi32>
    %324 = vector.extract_strided_slice %191 {offsets = [216, 0], sizes = [8, 16], strides = [1, 1]} : vector<256x16xf32> to vector<8x16xf32>
    %325 = vector.extract_strided_slice %5 {offsets = [216, 0], sizes = [8, 16], strides = [1, 1]} : vector<256x16xi32> to vector<8x16xi32>
    %326 = arith.cmpf olt, %324, %322 : vector<8x16xf32>
    %327 = arith.select %326, %324, %322 : vector<8x16xi1>, vector<8x16xf32>
    %328 = arith.select %326, %325, %323 : vector<8x16xi1>, vector<8x16xi32>
    %329 = vector.extract_strided_slice %191 {offsets = [224, 0], sizes = [8, 16], strides = [1, 1]} : vector<256x16xf32> to vector<8x16xf32>
    %330 = vector.extract_strided_slice %5 {offsets = [224, 0], sizes = [8, 16], strides = [1, 1]} : vector<256x16xi32> to vector<8x16xi32>
    %331 = arith.cmpf olt, %329, %327 : vector<8x16xf32>
    %332 = arith.select %331, %329, %327 : vector<8x16xi1>, vector<8x16xf32>
    %333 = arith.select %331, %330, %328 : vector<8x16xi1>, vector<8x16xi32>
    %334 = vector.extract_strided_slice %191 {offsets = [232, 0], sizes = [8, 16], strides = [1, 1]} : vector<256x16xf32> to vector<8x16xf32>
    %335 = vector.extract_strided_slice %5 {offsets = [232, 0], sizes = [8, 16], strides = [1, 1]} : vector<256x16xi32> to vector<8x16xi32>
    %336 = arith.cmpf olt, %334, %332 : vector<8x16xf32>
    %337 = arith.select %336, %334, %332 : vector<8x16xi1>, vector<8x16xf32>
    %338 = arith.select %336, %335, %333 : vector<8x16xi1>, vector<8x16xi32>
    %339 = vector.extract_strided_slice %191 {offsets = [240, 0], sizes = [8, 16], strides = [1, 1]} : vector<256x16xf32> to vector<8x16xf32>
    %340 = vector.extract_strided_slice %5 {offsets = [240, 0], sizes = [8, 16], strides = [1, 1]} : vector<256x16xi32> to vector<8x16xi32>
    %341 = arith.cmpf olt, %339, %337 : vector<8x16xf32>
    %342 = arith.select %341, %339, %337 : vector<8x16xi1>, vector<8x16xf32>
    %343 = arith.select %341, %340, %338 : vector<8x16xi1>, vector<8x16xi32>
    %344 = vector.extract_strided_slice %191 {offsets = [248, 0], sizes = [8, 16], strides = [1, 1]} : vector<256x16xf32> to vector<8x16xf32>
    %345 = vector.extract_strided_slice %5 {offsets = [248, 0], sizes = [8, 16], strides = [1, 1]} : vector<256x16xi32> to vector<8x16xi32>
    %346 = arith.cmpf olt, %344, %342 : vector<8x16xf32>
    %347 = arith.select %346, %344, %342 : vector<8x16xi1>, vector<8x16xf32>
    %348 = arith.select %346, %345, %343 : vector<8x16xi1>, vector<8x16xi32>
    %cst_29 = arith.constant dense<0x7F800000> : vector<16xf32>
    %349 = vector.multi_reduction <minimumf>, %347, %cst_29 [0] : vector<8x16xf32> to vector<16xf32>
    %350 = vector.shape_cast %349 : vector<16xf32> to vector<1x16xf32>
    %351 = vector.broadcast %350 : vector<1x16xf32> to vector<8x16xf32>
    %352 = arith.cmpf oeq, %347, %351 : vector<8x16xf32>
    %c256_i32_30 = arith.constant 256 : i32
    %353 = vector.broadcast %c256_i32_30 : i32 to vector<8x16xi32>
    %354 = arith.select %352, %348, %353 : vector<8x16xi1>, vector<8x16xi32>
    %cst_31 = arith.constant dense<2147483647> : vector<16xi32>
    %355 = vector.multi_reduction <minsi>, %354, %cst_31 [0] : vector<8x16xi32> to vector<16xi32>
    %356 = vector.shape_cast %355 : vector<16xi32> to vector<1x16xi32>
    %357 = vector.broadcast %356 : vector<1x16xi32> to vector<256x16xi32>
    %358 = arith.cmpi eq, %5, %357 : vector<256x16xi32>
    %359 = arith.extui %358 : vector<256x16xi1> to vector<256x16xi32>
    %360 = arith.sitofp %359 : vector<256x16xi32> to vector<256x16xf32>
    %c1_32 = arith.constant 1 : index
    %c0_33 = arith.constant 0 : index
    %c0_34 = arith.constant 0 : index
    %361 = vector.load %arg4[%c1_32, %c0_33, %c0_34] : memref<2x32x256xf32, #tpu.memory_space<vmem>>, vector<1x32x256xf32>
    %362 = vector.shape_cast %361 : vector<1x32x256xf32> to vector<32x256xf32>
    %cst_35 = arith.constant dense<0.000000e+00> : vector<32x16xf32>
    %363 = tpu.matmul %362, %360, %cst_35 {dimension_numbers = #tpu.dot_dimension_numbers<[1], [0], [0], [1], [0, 0, 1, 1], [], []>} : vector<32x256xf32>, vector<256x16xf32>, vector<32x16xf32> -> vector<32x16xf32>
    %c0_36 = arith.constant 0 : index
    %c0_37 = arith.constant 0 : index
    %364 = vector.load %arg7[%c0_36, %c0_37] : memref<40x16xf32, #tpu.memory_space<vmem>>, vector<32x16xf32>
    %365 = arith.subf %364, %363 : vector<32x16xf32>
    %c0_38 = arith.constant 0 : index
    %c0_39 = arith.constant 0 : index
    %366 = vector.load %arg7[%c0_38, %c0_39] : memref<40x16xf32, #tpu.memory_space<vmem>>, vector<32x16xf32>
    tpu.vector_store %arg7[%c0_38, %c0_39], %365 {strides = array<i32>} : memref<40x16xf32, #tpu.memory_space<vmem>>, vector<32x16xf32>,
    %c0_40 = arith.constant 0 : index
    %c1_41 = arith.constant 1 : index
    %c0_42 = arith.constant 0 : index
    %367 = vector.load %arg6[%c0_40, %c1_41, %c0_42] : memref<1x2x16xi32, #tpu.memory_space<vmem>>, vector<1x1x16xi32>
    %368 = vector.shape_cast %367 : vector<1x1x16xi32> to vector<1x16xi32>
    %369 = vector.shape_cast %356 : vector<1x16xi32> to vector<1x1x16xi32>
    tpu.vector_store %arg6[%c0_40, %c1_41, %c0_42], %369 {strides = array<i32>} : memref<1x2x16xi32, #tpu.memory_space<vmem>>, vector<1x1x16xi32>,
    %c0_43 = arith.constant 0 : index
    %c0_44 = arith.constant 0 : index
    %c0_45 = arith.constant 0 : index
    %370 = vector.load %arg2[%c0_43, %c0_44, %c0_45] : memref<1x32x16xf32, #tpu.memory_space<vmem>>, vector<1x32x16xf32>
    %371 = vector.shape_cast %370 : vector<1x32x16xf32> to vector<32x16xf32>
    %c0_46 = arith.constant 0 : index
    %c0_47 = arith.constant 0 : index
    %372 = vector.load %arg7[%c0_46, %c0_47] : memref<40x16xf32, #tpu.memory_space<vmem>>, vector<32x16xf32>
    %373 = arith.subf %371, %372 : vector<32x16xf32>
    %c0_48 = arith.constant 0 : index
    %c0_49 = arith.constant 0 : index
    %c0_50 = arith.constant 0 : index
    %374 = vector.load %arg5[%c0_48, %c0_49, %c0_50] : memref<1x32x16xf32, #tpu.memory_space<vmem>>, vector<1x32x16xf32>
    %375 = vector.shape_cast %374 : vector<1x32x16xf32> to vector<32x16xf32>
    %376 = vector.shape_cast %373 : vector<32x16xf32> to vector<1x32x16xf32>
    tpu.vector_store %arg5[%c0_48, %c0_49, %c0_50], %376 {strides = array<i32>} : memref<1x32x16xf32, #tpu.memory_space<vmem>>, vector<1x32x16xf32>,
    return
  }
  func.func @transform_0(%arg0: i32, %arg1: i32) -> (i32, i32, i32) {
    %c0_i32 = arith.constant 0 : i32
    %c0_i32_0 = arith.constant 0 : i32
    return %arg0, %c0_i32, %arg1 : i32, i32, i32
  }
  func.func @transform_1(%arg0: i32, %arg1: i32) -> (i32, i32, i32) {
    %c0_i32 = arith.constant 0 : i32
    %c0_i32_0 = arith.constant 0 : i32
    %c0_i32_1 = arith.constant 0 : i32
    %c0_i32_2 = arith.constant 0 : i32
    return %c0_i32, %c0_i32_0, %c0_i32_1 : i32, i32, i32
  }
  func.func @transform_2(%arg0: i32, %arg1: i32) -> (i32, i32, i32) {
    %c0_i32 = arith.constant 0 : i32
    %c0_i32_0 = arith.constant 0 : i32
    %c0_i32_1 = arith.constant 0 : i32
    %c0_i32_2 = arith.constant 0 : i32
    return %c0_i32, %c0_i32_0, %c0_i32_1 : i32, i32, i32
  }
  func.func @transform_3(%arg0: i32, %arg1: i32) -> (i32, i32, i32) {
    %c0_i32 = arith.constant 0 : i32
    %c0_i32_0 = arith.constant 0 : i32
    return %arg0, %c0_i32, %arg1 : i32, i32, i32
  }
  func.func @transform_4(%arg0: i32, %arg1: i32) -> (i32, i32, i32) {
    %c0_i32 = arith.constant 0 : i32
    %c0_i32_0 = arith.constant 0 : i32
    return %arg0, %c0_i32, %arg1 : i32, i32, i32
  }
}

</mosaic_0001>

<bundles_post_ra>
// kernel: vq1d_forward.1
= control target key start
LH: loop header
LB: loop body
LE: loop exit
PB: predicated region body
PF: predicated region fallthrough
CT: control target
= control target key end

     0   :  { %10 = vsyncpa [#allocation4], 0  ;;  %s3381_s0 = inlined_call_operand.vmem [shape: f32[2,32,16], index: 0, kind: input, shape index: {}]   ;;  %s3382_s1 = inlined_call_operand.vmem [shape: f32[2,256,40], index: 1, kind: input, shape index: {}]   ;;  %s3383_s2 = inlined_call_operand.vmem [shape: f32[2,32,256], index: 2, kind: input, shape index: {}]   ;;  %s3384_s3 = inlined_call_operand.vmem [shape: f32[2,32,16], index: 3, kind: output, shape index: {0}]   ;;  %s3385_s4 = inlined_call_operand.hbm [shape: s32[2,2,16], index: 4, kind: output, shape index: {1}]  }
   0x1   :  { %12 = vsyncpa [#allocation4 + $0x1], 0  ;;  %s2556_s15 = smov 0   ;;  %s2558_s16 = smov 0  }
   0x2   :  { %s2560_s17 = smov 0   ;;  %s2562_s18 = smov 0  }
   0x3   :  { %s2564_s19 = smov 0   ;;  %s2566_s20 = smov 0  }
   0x4 LB: > { %s1785_s21 = sadd.s32 4294967295, %s2526_s20   ;;  %s1786_s22 = sadd.s32 4294967294, %s2526_s20   ;;  %s2526_s20 = sphi %s2566_s20, %s18_s20   ;;  %s2522_s19 = sphi %s2564_s19, %s3392_s19   ;;  %s2518_s18 = sphi %s2562_s18, %s3391_s18   ;;  %s2514_s17 = sphi %s2560_s17, %s3390_s17   ;;  %s2510_s16 = sphi %s2558_s16, %s3389_s16   ;;  %s2506_s15 = sphi %s2556_s15, %s3388_s15  }
   0x5   : > { %s30_s23 = sadd.s32 1, %s2522_s19  ;;  %s137_s24 = sadd.s32 1, %s2514_s17 }
   0x6   : > { %p32_p0 = scmp.ge.s32.totalorder %s30_s23, 2  ;;  %p147_p1 = scmp.ne.s32.totalorder %s2514_s17, %s2510_s16 }
   0x7   : > { %p148_p2 = scmp.eq.s32.totalorder %s1785_s21, 1  ;;  %p153_p3 = scmp.ne.s32.totalorder %s2510_s16, %s2506_s15 }
   0x8   : > { %s3394_s23 = smov (%p32_p0, %s30_s23), 0  ;;  %p154_p5 = scmp.eq.s32.totalorder %s1786_s22, 1 }
   0x9   : > { %p2596_p4 = por %p148_p2, %p147_p1  ;;  %s132_s26 = ssub.s32 %s2522_s19, %s3394_s23 }
   0xa   : > { %p1789_p6 = scmp.ge.s32.totalorder %s2526_s20, 1  ;;  %p135_p7 = scmp.eq.s32.totalorder %s132_s26, 0 }
   0xb   : > { %p2603_p8 = por %p154_p5, %p153_p3  ;;  %p189_p9 = scmp.lt.s32.totalorder %s2526_s20, 3 }
   0xc   : > { %s2609_s28 = scalar_select %p135_p7, %s2514_s17, %s137_s24  }
   0xd   : > { %p190_p10 = pnand %p1789_p6, %p189_p9 }
   0xe   : > { %p226_p11 = scmp.lt.s32.totalorder (!%p190_p10), %s2518_s18, 1  ;;  %vm246_vm0 = vcmask (!%p190_p10), 130048   ;;  %v285_v0 = vld [vmem:[%s3382_s1] sm:$0xff] (!%p190_p10)  ;;  %vm322_vm1 = vcmask (!%p190_p10), 326656   ;;  %v2528_v1 = vmov (!%p190_p10), 1.0   ;;  %v286_v13 = vld [vmem:[%s3382_s1 + $0x8] sm:$0xff] (!%p190_p10)  ;;  %v252_v44 = vlaneseq (!%p190_p10) }
   0xf   : > { %193 = sbr.rel (%p190_p10) target bundleno = 1210 (0x4ba), region = 32  ;;  %251 = vst.msk [vmem:[#allocation2 + $0x20] sm:$0xff] (!%p190_p10), %vm246_vm0, %v2528_v1  ;;  %2205 = vmatprep.mubr.msk.f32.mxu0 (!%p190_p10), %vm322_vm1, %v285_v0  ;;  %v287_v14 = vld [vmem:[%s3382_s1 + $0x10] sm:$0xff] (!%p190_p10)  ;;  %v288_v15 = vld [vmem:[%s3382_s1 + $0x18] sm:$0xff] (!%p190_p10)  ;;  %v289_v16 = vld [vmem:[%s3382_s1 + $0x20] sm:$0xff] (!%p190_p10)  ;;  %s223_s8 = sand.u32 (!%p190_p10), 1, %s2510_s16  }
  0x10   : > { %v290_v17 = vld [vmem:[%s3382_s1 + $0x28] sm:$0xff] (!%p190_p10)  ;;  %v291_v18 = vld [vmem:[%s3382_s1 + $0x30] sm:$0xff] (!%p190_p10)  ;;  %v292_v19 = vld [vmem:[%s3382_s1 + $0x38] sm:$0xff] (!%p190_p10)  ;;  %v2779_v46 = vshrl.u32 (!%p190_p10), %v252_v44, 7  ;;  %s1790_s10 = sshll.u32 (!%p190_p10), %s223_s8, 1  ;;  %s2028_s26 = sshll.u32 (!%p190_p10), %s2518_s18, 5 }
  0x11   : > { %v293_v20 = vld [vmem:[%s3382_s1 + $0x40] sm:$0xff] (!%p190_p10)  ;;  %v294_v21 = vld [vmem:[%s3382_s1 + $0x48] sm:$0xff] (!%p190_p10)  ;;  %v295_v22 = vld [vmem:[%s3382_s1 + $0x50] sm:$0xff] (!%p190_p10)  ;;  %s2921_s11 = scalar_lea.vmem (!%p190_p10), [#allocation3], %s1790_s10  ;;  %s3316_s7 = scalar_lea.hbm (!%p190_p10), %s3385_s4, %s2028_s26 }
  0x12   : > { %v296_v23 = vld [vmem:[%s3382_s1 + $0x58] sm:$0xff] (!%p190_p10)  ;;  %v297_v24 = vld [vmem:[%s3382_s1 + $0x60] sm:$0xff] (!%p190_p10)  ;;  %v298_v25 = vld [vmem:[%s3382_s1 + $0x68] sm:$0xff] (!%p190_p10)  ;;  %v2782_v49 = vadd.s32 (!%p190_p10), 8, %v2779_v46  ;;  %v2785_v51 = vadd.s32 (!%p190_p10), 16, %v2779_v46  ;;  %v2788_v53 = vadd.s32 (!%p190_p10), 24, %v2779_v46 }
  0x13   : > { %v299_v26 = vld [vmem:[%s3382_s1 + $0x70] sm:$0xff] (!%p190_p10)  ;;  %v300_v27 = vld [vmem:[%s3382_s1 + $0x78] sm:$0xff] (!%p190_p10)  ;;  %v301_v28 = vld [vmem:[%s3382_s1 + $0x80] sm:$0xff] (!%p190_p10)  ;;  %v2794_v58 = vadd.s32 (!%p190_p10), 32, %v2779_v46  ;;  %v2798_v61 = vadd.s32 (!%p190_p10), 40, %v2779_v46  ;;  %s1675_s10 = sshll.u32 (!%p190_p10), %s2921_s11, 4  ;;  %s1676_s10 = int_to_ptr.vmem [resolvable:$true] %s1675_s10 }
  0x14   : > { %v302_v29 = vld [vmem:[%s3382_s1 + $0x88] sm:$0xff] (!%p190_p10)  ;;  %v303_v30 = vld [vmem:[%s3382_s1 + $0x90] sm:$0xff] (!%p190_p10)  ;;  %v304_v31 = vld [vmem:[%s3382_s1 + $0x98] sm:$0xff] (!%p190_p10)  ;;  %s1658_s12 = scalar_lea.sflag (!%p190_p10), [#allocation4], %s223_s8  ;;  %s2448_s13 = scalar_lea.vmem (!%p190_p10), %s1676_s10, 32 }
  0x15   : > { %v305_v32 = vld [vmem:[%s3382_s1 + $0xa0] sm:$0xff] (!%p190_p10)  ;;  %v306_v33 = vld [vmem:[%s3382_s1 + $0xa8] sm:$0xff] (!%p190_p10)  ;;  %v307_v34 = vld [vmem:[%s3382_s1 + $0xb0] sm:$0xff] (!%p190_p10)  ;;  %p2449_p12 = scmp.ne.s32.totalorder (!%p190_p10), %s1676_s10, %s2448_s13  ;;  %s2530_s14 = smov (!%p190_p10), [#allocation3]  }
  0x16   : > { %s2618_s5 = scalar_select %p226_p11, %s2518_s18, 1  ;;  %v2648_v12 = vld [vmem:[#allocation2 + $0x20] sm:$0xff]  ;;  %v308_v35 = vld [vmem:[%s3382_s1 + $0xb8] sm:$0xff]  ;;  %v310_v37 = vld [vmem:[%s3382_s1 + $0xc8] sm:$0xff] }
  0x17   : > { %v309_v36 = vld [vmem:[%s3382_s1 + $0xc0] sm:$0xff]  ;;  %v311_v38 = vld [vmem:[%s3382_s1 + $0xd0] sm:$0xff]  ;;  %v312_v39 = vld [vmem:[%s3382_s1 + $0xd8] sm:$0xff]  ;;  %p2450_p13 = pnand %p2449_p12, %p2596_p4  ;;  %s2452_s21 = sshll.u32 %s2530_s14, 4  ;;  %s2453_s21 = int_to_ptr.vmem [resolvable:$false] %s2452_s21 }
  0x18   : > { %s2031_s6 = sshll.u32 %s2618_s5, 5  ;;  %v313_v40 = vld [vmem:[%s3382_s1 + $0xe0] sm:$0xff]  ;;  %v314_v41 = vld [vmem:[%s3382_s1 + $0xe8] sm:$0xff]  ;;  %v315_v42 = vld [vmem:[%s3382_s1 + $0xf0] sm:$0xff]  ;;  %s2454_s22 = scalar_lea.vmem %s2453_s21, 64 }
  0x19   : > { %s2626_s9 = scalar_lea.vmem %s3381_s0, %s2031_s6  ;;  %v316_v43 = vld [vmem:[%s3382_s1 + $0xf8] sm:$0xff]  ;;  %v853_v45 = vld [vmem:[%s3383_s2 + $0x8] sm:$0xff]  ;;  %p2451_p0 = pneg %p2450_p13 }
  0x1a   : > { %v242_v2 = vld [vmem:[%s2626_s9] sm:$0xff]  ;;  %v243_v3 = vld [vmem:[%s2626_s9 + $0x8] sm:$0xff]  ;;  %v244_v4 = vld [vmem:[%s2626_s9 + $0x10] sm:$0xff]  ;;  %924 = vmatprep.mubr.f32.mxu1 %v853_v45  ;;  %p2455_p1 = scmp.lt.s32.totalorder %s1676_s10, %s2453_s21  ;;  %p2456_p2 = scmp.lt.s32.totalorder %s2454_s22, %s2448_s13 }
  0x1b   : > { %247 = vst.msk [vmem:[#allocation2] sm:$0xff] %vm246_vm0, %v242_v2  ;;  %248 = vst.msk [vmem:[#allocation2 + $0x8] sm:$0xff] %vm246_vm0, %v243_v3  ;;  %v245_v5 = vld [vmem:[%s2626_s9 + $0x18] sm:$0xff]  ;;  %v2802_v2 = vadd.s32 48, %v2779_v46 }
  0x1c   : > { %249 = vst.msk [vmem:[#allocation2 + $0x10] sm:$0xff] %vm246_vm0, %v244_v4  ;;  %250 = vst.msk [vmem:[#allocation2 + $0x18] sm:$0xff] %vm246_vm0, %v245_v5  ;;  %v2806_v5 = vadd.s32 56, %v2779_v46  ;;  %p2457_p3 = por %p2456_p2, %p2455_p1 }
  0x1e   : > { %p2458_p5 = pnand %p2457_p3, %p2451_p0 }
  0x22   : > { %v2636_v6 = vld [vmem:[#allocation2] sm:$0xff]  ;;  %v2638_v7 = vld [vmem:[#allocation2 + $0x8] sm:$0xff] }
  0x23   : > { %v2640_v8 = vld [vmem:[#allocation2 + $0x10] sm:$0xff]  ;;  %v2311_v9 = vpack.c.bf16 %v2638_v7, %v2636_v6  ;;  %v2644_v10 = vld [vmem:[#allocation2 + $0x18] sm:$0xff] }
  0x24   : > { %v2315_v11 = vpack.c.bf16 %v2644_v10, %v2640_v8 }
  0x25   : > { %2312 = vmatprep.subr.bf16.mxu0 %v2311_v9 }
  0x26   : > { %2314 = vmatpush3.bf16.msra.mxu0 %v2311_v9 }
  0x27   : > { %2316 = vmatprep.subr.bf16.mxu0 %v2315_v11 }
  0x2a   : > { %2318 = vmatpush3.bf16.msra.mxu0 %v2315_v11 }
  0x2b   : > { %2203 = vmatprep.subr.mxu0 %v2648_v12 }
  0x2e   : > { %2204 = vmatpush3.msra.mxu0 %v2648_v12 }
  0x2f   : > { %2206 = vmatmul.mubr.msk.f32.vlgmr.msra.gmra.mrb[0].mxu0 %vm322_vm1, %v286_v13 }
  0x30   : > { %2208 = vmatprep.mubr.msk.f32.mxu0 %vm322_vm1, %v287_v14 }
  0x33   : > { %2209 = vmatmul.mubr.msk.f32.gmra.mrb[2].mxu0 %vm322_vm1, %v288_v15  ;;  %v2810_v15 = vadd.s32 64, %v2779_v46 }
  0x34   : > { %2211 = vmatprep.mubr.msk.f32.mxu0 %vm322_vm1, %v289_v16 }
  0x37   : > { %2212 = vmatmul.mubr.msk.f32.gmra.mrb[4].mxu0 %vm322_vm1, %v290_v17 }
  0x38   : > { %2214 = vmatprep.mubr.msk.f32.mxu0 %vm322_vm1, %v291_v18  ;;  %v2814_v18 = vadd.s32 72, %v2779_v46 }
  0x3b   : > { %2215 = vmatmul.mubr.msk.f32.gmra.mrb[6].mxu0 %vm322_vm1, %v292_v19 }
  0x3c   : > { %2217 = vmatprep.mubr.msk.f32.mxu0 %vm322_vm1, %v293_v20 }
  0x3f   : > { %2218 = vmatmul.mubr.msk.f32.gmra.mrb[8].mxu0 %vm322_vm1, %v294_v21 }
  0x40   : > { %2220 = vmatprep.mubr.msk.f32.mxu0 %vm322_vm1, %v295_v22 }
  0x43   : > { %2221 = vmatmul.mubr.msk.f32.gmra.mrb[10].mxu0 %vm322_vm1, %v296_v23  ;;  %v2818_v23 = vadd.s32 80, %v2779_v46 }
  0x44   : > { %2223 = vmatprep.mubr.msk.f32.mxu0 %vm322_vm1, %v297_v24 }
  0x47   : > { %2224 = vmatmul.mubr.msk.f32.gmra.mrb[12].mxu0 %vm322_vm1, %v298_v25 }
  0x48   : > { %2226 = vmatprep.mubr.msk.f32.mxu0 %vm322_vm1, %v299_v26  ;;  %v2822_v26 = vadd.s32 88, %v2779_v46 }
  0x4b   : > { %2227 = vmatmul.mubr.msk.f32.gmra.mrb[14].mxu0 %vm322_vm1, %v300_v27 }
  0x4c   : > { %2229 = vmatprep.mubr.msk.f32.mxu0 %vm322_vm1, %v301_v28 }
  0x4f   : > { %2230 = vmatmul.mubr.msk.f32.gmra.mrb[16].mxu0 %vm322_vm1, %v302_v29 }
  0x50   : > { %2232 = vmatprep.mubr.msk.f32.mxu0 %vm322_vm1, %v303_v30 }
  0x53   : > { %2233 = vmatmul.mubr.msk.f32.gmra.mrb[18].mxu0 %vm322_vm1, %v304_v31  ;;  %v2826_v31 = vadd.s32 96, %v2779_v46 }
  0x54   : > { %2235 = vmatprep.mubr.msk.f32.mxu0 %vm322_vm1, %v305_v32 }
  0x57   : > { %2236 = vmatmul.mubr.msk.f32.gmra.mrb[20].mxu0 %vm322_vm1, %v306_v33 }
  0x58   : > { %2238 = vmatprep.mubr.msk.f32.mxu0 %vm322_vm1, %v307_v34  ;;  %v2830_v34 = vadd.s32 104, %v2779_v46 }
  0x5b   : > { %2239 = vmatmul.mubr.msk.f32.gmra.mrb[22].mxu0 %vm322_vm1, %v308_v35 }
  0x5c   : > { %2241 = vmatprep.mubr.msk.f32.mxu0 %vm322_vm1, %v309_v36 }
  0x5f   : > { %2242 = vmatmul.mubr.msk.f32.gmra.mrb[24].mxu0 %vm322_vm1, %v310_v37 }
  0x60   : > { %2244 = vmatprep.mubr.msk.f32.mxu0 %vm322_vm1, %v311_v38 }
  0x63   : > { %2245 = vmatmul.mubr.msk.f32.gmra.mrb[26].mxu0 %vm322_vm1, %v312_v39  ;;  %v2834_v39 = vadd.s32 112, %v2779_v46 }
  0x64   : > { %2247 = vmatprep.mubr.msk.f32.mxu0 %vm322_vm1, %v313_v40 }
  0x67   : > { %2248 = vmatmul.mubr.msk.f32.gmra.mrb[28].mxu0 %vm322_vm1, %v314_v41 }
  0x68   : > { %2250 = vmatprep.mubr.msk.f32.mxu0 %vm322_vm1, %v315_v42  ;;  %v2838_v42 = vadd.s32 120, %v2779_v46 }
  0x6b   : > { %2251 = vmatmul.mubr.msk.f32.gmra.mrb[30].mxu0 %vm322_vm1, %v316_v43 }
 0x102   : > { %v2207_v47 = vpop.f32.mrb[0].mxu0 }
 0x103   : > { %v485_v48 = vpop.f32.mrb[1].mxu0 }
 0x104   : > { %vm644_vm2 = vcmp.lt.f32.partialorder %v2207_v47, %v485_v48 }
 0x105   : > { %v645_v50 = vsel %vm644_vm2, %v2207_v47, %v485_v48  ;;  %v646_v55 = vsel %vm644_vm2, %v2782_v49, %v2779_v46  ;;  %v2842_v48 = vadd.s32 128, %v2779_v46 }
 0x106   : > { %v2210_v52 = vpop.f32.mrb[2].mxu0 }
 0x107   : > { %v495_v54 = vpop.f32.mrb[3].mxu0 }
 0x108   : > { %vm647_vm3 = vcmp.lt.f32.partialorder %v495_v54, %v645_v50 }
 0x109   : > { %v648_v56 = vsel %vm647_vm3, %v495_v54, %v645_v50  ;;  %v649_v57 = vsel %vm647_vm3, %v2785_v51, %v646_v55  ;;  %v2846_v54 = vadd.s32 136, %v2779_v46 }
 0x10a   : > { %vm650_vm4 = vcmp.lt.f32.partialorder %v2210_v52, %v648_v56  ;;  %v2213_v59 = vpop.f32.mrb[4].mxu0 }
 0x10b   : > { %v652_v60 = vsel %vm650_vm4, %v2788_v53, %v649_v57  ;;  %v505_v62 = vpop.f32.mrb[5].mxu0  ;;  %v651_v63 = vsel %vm650_vm4, %v2210_v52, %v648_v56 }
 0x10c   : > { %vm653_vm5 = vcmp.lt.f32.partialorder %v505_v62, %v651_v63 }
 0x10d   : > { %v654_v0 = vsel %vm653_vm5, %v505_v62, %v651_v63  ;;  %v655_v1 = vsel %vm653_vm5, %v2794_v58, %v652_v60  ;;  %v2850_v60 = vadd.s32 144, %v2779_v46 }
 0x10e   : > { %vm656_vm6 = vcmp.lt.f32.partialorder %v2213_v59, %v654_v0  ;;  %v2216_v3 = vpop.f32.mrb[6].mxu0 }
 0x10f   : > { %v658_v4 = vsel %vm656_vm6, %v2798_v61, %v655_v1  ;;  %v515_v9 = vpop.f32.mrb[7].mxu0  ;;  %v657_v11 = vsel %vm656_vm6, %v2213_v59, %v654_v0  ;;  %v2854_v0 = vadd.s32 152, %v2779_v46 }
 0x110   : > { %vm659_vm7 = vcmp.lt.f32.partialorder %v515_v9, %v657_v11 }
 0x111   : > { %v660_v13 = vsel %vm659_vm7, %v515_v9, %v657_v11  ;;  %v661_v14 = vsel %vm659_vm7, %v2802_v2, %v658_v4  ;;  %v2858_v11 = vadd.s32 160, %v2779_v46 }
 0x112   : > { %vm662_vm8 = vcmp.lt.f32.partialorder %v2216_v3, %v660_v13  ;;  %v2219_v16 = vpop.f32.mrb[8].mxu0 }
 0x113   : > { %v664_v17 = vsel %vm662_vm8, %v2806_v5, %v661_v14  ;;  %v525_v19 = vpop.f32.mrb[9].mxu0  ;;  %v663_v20 = vsel %vm662_vm8, %v2216_v3, %v660_v13 }
 0x114   : > { %vm665_vm9 = vcmp.lt.f32.partialorder %v525_v19, %v663_v20 }
 0x115   : > { %v666_v21 = vsel %vm665_vm9, %v525_v19, %v663_v20  ;;  %v667_v22 = vsel %vm665_vm9, %v2810_v15, %v664_v17 }
 0x116   : > { %vm668_vm10 = vcmp.lt.f32.partialorder %v2219_v16, %v666_v21  ;;  %v2222_v24 = vpop.f32.mrb[10].mxu0 }
 0x117   : > { %v670_v25 = vsel %vm668_vm10, %v2814_v18, %v667_v22  ;;  %v535_v27 = vpop.f32.mrb[11].mxu0  ;;  %v669_v28 = vsel %vm668_vm10, %v2219_v16, %v666_v21  ;;  %v2862_v16 = vadd.s32 168, %v2779_v46  ;;  %v2866_v22 = vadd.s32 176, %v2779_v46 }
 0x118   : > { %vm671_vm11 = vcmp.lt.f32.partialorder %v535_v27, %v669_v28 }
 0x119   : > { %v672_v29 = vsel %vm671_vm11, %v535_v27, %v669_v28  ;;  %v673_v30 = vsel %vm671_vm11, %v2818_v23, %v670_v25  ;;  %v2870_v27 = vadd.s32 184, %v2779_v46 }
 0x11a   : > { %vm674_vm12 = vcmp.lt.f32.partialorder %v2222_v24, %v672_v29  ;;  %v2225_v32 = vpop.f32.mrb[12].mxu0 }
 0x11b   : > { %v676_v33 = vsel %vm674_vm12, %v2822_v26, %v673_v30  ;;  %v545_v35 = vpop.f32.mrb[13].mxu0  ;;  %v675_v36 = vsel %vm674_vm12, %v2222_v24, %v672_v29 }
 0x11c   : > { %vm677_vm13 = vcmp.lt.f32.partialorder %v545_v35, %v675_v36 }
 0x11d   : > { %v678_v37 = vsel %vm677_vm13, %v545_v35, %v675_v36  ;;  %v679_v38 = vsel %vm677_vm13, %v2826_v31, %v676_v33  ;;  %v2874_v33 = vadd.s32 192, %v2779_v46 }
 0x11e   : > { %vm680_vm14 = vcmp.lt.f32.partialorder %v2225_v32, %v678_v37  ;;  %v2228_v40 = vpop.f32.mrb[14].mxu0 }
 0x11f   : > { %v682_v41 = vsel %vm680_vm14, %v2830_v34, %v679_v38  ;;  %v555_v43 = vpop.f32.mrb[15].mxu0  ;;  %v681_v44 = vsel %vm680_vm14, %v2225_v32, %v678_v37  ;;  %v2878_v37 = vadd.s32 200, %v2779_v46 }
 0x120   : > { %vm683_vm15 = vcmp.lt.f32.partialorder %v555_v43, %v681_v44 }
 0x121   : > { %v684_v45 = vsel %vm683_vm15, %v555_v43, %v681_v44  ;;  %v685_v47 = vsel %vm683_vm15, %v2834_v39, %v682_v41  ;;  %v2882_v44 = vadd.s32 208, %v2779_v46 }
 0x122   : > { %vm686_vm2 = vcmp.lt.f32.partialorder %v2228_v40, %v684_v45  ;;  %v2231_v50 = vpop.f32.mrb[16].mxu0 }
 0x123   : > { %v688_v52 = vsel %vm686_vm2, %v2838_v42, %v685_v47  ;;  %v565_v55 = vpop.f32.mrb[17].mxu0  ;;  %v687_v56 = vsel %vm686_vm2, %v2228_v40, %v684_v45 }
 0x124   : > { %vm689_vm3 = vcmp.lt.f32.partialorder %v565_v55, %v687_v56 }
 0x125   : > { %v690_v57 = vsel %vm689_vm3, %v565_v55, %v687_v56  ;;  %v691_v59 = vsel %vm689_vm3, %v2842_v48, %v688_v52 }
 0x126   : > { %vm692_vm4 = vcmp.lt.f32.partialorder %v2231_v50, %v690_v57  ;;  %v2234_v62 = vpop.f32.mrb[18].mxu0 }
 0x127   : > { %v694_v63 = vsel %vm692_vm4, %v2846_v54, %v691_v59  ;;  %v575_v1 = vpop.f32.mrb[19].mxu0  ;;  %v693_v3 = vsel %vm692_vm4, %v2231_v50, %v690_v57  ;;  %v2886_v50 = vadd.s32 216, %v2779_v46  ;;  %v2890_v59 = vadd.s32 224, %v2779_v46 }
 0x128   : > { %vm695_vm5 = vcmp.lt.f32.partialorder %v575_v1, %v693_v3 }
 0x129   : > { %v696_v4 = vsel %vm695_vm5, %v575_v1, %v693_v3  ;;  %v697_v9 = vsel %vm695_vm5, %v2850_v60, %v694_v63  ;;  %v2894_v1 = vadd.s32 232, %v2779_v46 }
 0x12a   : > { %vm698_vm6 = vcmp.lt.f32.partialorder %v2234_v62, %v696_v4  ;;  %v2237_v13 = vpop.f32.mrb[20].mxu0 }
 0x12b   : > { %v700_v14 = vsel %vm698_vm6, %v2854_v0, %v697_v9  ;;  %v585_v17 = vpop.f32.mrb[21].mxu0  ;;  %v699_v19 = vsel %vm698_vm6, %v2234_v62, %v696_v4 }
 0x12c   : > { %vm701_vm7 = vcmp.lt.f32.partialorder %v585_v17, %v699_v19 }
 0x12d   : > { %v702_v20 = vsel %vm701_vm7, %v585_v17, %v699_v19  ;;  %v703_v21 = vsel %vm701_vm7, %v2858_v11, %v700_v14  ;;  %v2898_v14 = vadd.s32 240, %v2779_v46 }
 0x12e   : > { %vm704_vm8 = vcmp.lt.f32.partialorder %v2237_v13, %v702_v20  ;;  %v2240_v24 = vpop.f32.mrb[22].mxu0 }
 0x12f   : > { %v706_v25 = vsel %vm704_vm8, %v2862_v16, %v703_v21  ;;  %v595_v28 = vpop.f32.mrb[23].mxu0  ;;  %v705_v29 = vsel %vm704_vm8, %v2237_v13, %v702_v20  ;;  %v2902_v20 = vadd.s32 248, %v2779_v46  ;;  %vm957_vm8 = vcmask 122880  }
 0x130   : > { %vm707_vm9 = vcmp.lt.f32.partialorder %v595_v28, %v705_v29 }
 0x131   : > { %v708_v30 = vsel %vm707_vm9, %v595_v28, %v705_v29  ;;  %v709_v32 = vsel %vm707_vm9, %v2866_v22, %v706_v25 }
 0x132   : > { %vm710_vm10 = vcmp.lt.f32.partialorder %v2240_v24, %v708_v30  ;;  %v2243_v35 = vpop.f32.mrb[24].mxu0 }
 0x133   : > { %v712_v36 = vsel %vm710_vm10, %v2870_v27, %v709_v32  ;;  %v605_v38 = vpop.f32.mrb[25].mxu0  ;;  %v711_v40 = vsel %vm710_vm10, %v2240_v24, %v708_v30 }
 0x134   : > { %vm713_vm11 = vcmp.lt.f32.partialorder %v605_v38, %v711_v40 }
 0x135   : > { %v714_v41 = vsel %vm713_vm11, %v605_v38, %v711_v40  ;;  %v715_v43 = vsel %vm713_vm11, %v2874_v33, %v712_v36 }
 0x136   : > { %vm716_vm12 = vcmp.lt.f32.partialorder %v2243_v35, %v714_v41  ;;  %v2246_v45 = vpop.f32.mrb[26].mxu0 }
 0x137   : > { %v718_v47 = vsel %vm716_vm12, %v2878_v37, %v715_v43  ;;  %v615_v52 = vpop.f32.mrb[27].mxu0  ;;  %v717_v55 = vsel %vm716_vm12, %v2243_v35, %v714_v41 }
 0x138   : > { %vm719_vm13 = vcmp.lt.f32.partialorder %v615_v52, %v717_v55 }
 0x139   : > { %v720_v56 = vsel %vm719_vm13, %v615_v52, %v717_v55  ;;  %v721_v57 = vsel %vm719_vm13, %v2882_v44, %v718_v47 }
 0x13a   : > { %vm722_vm14 = vcmp.lt.f32.partialorder %v2246_v45, %v720_v56  ;;  %v2249_v62 = vpop.f32.mrb[28].mxu0 }
 0x13b   : > { %v724_v63 = vsel %vm722_vm14, %v2886_v50, %v721_v57  ;;  %v625_v3 = vpop.f32.mrb[29].mxu0  ;;  %v723_v4 = vsel %vm722_vm14, %v2246_v45, %v720_v56 }
 0x13c   : > { %vm725_vm15 = vcmp.lt.f32.partialorder %v625_v3, %v723_v4 }
 0x13d   : > { %v726_v9 = vsel %vm725_vm15, %v625_v3, %v723_v4  ;;  %v727_v13 = vsel %vm725_vm15, %v2890_v59, %v724_v63  ;;  %v2529_v3 = vmov 1.0|1.0   ;;  %v852_v4 = vld [vmem:[%s3383_s2] sm:$0xff] }
 0x13e   : > { %vm728_vm2 = vcmp.lt.f32.partialorder %v2249_v62, %v726_v9  ;;  %v2252_v17 = vpop.f32.mrb[30].mxu0 }
 0x13f   : > { %v730_v19 = vsel %vm728_vm2, %v2894_v1, %v727_v13  ;;  %v635_v21 = vpop.f32.mrb[31].mxu0  ;;  %v729_v24 = vsel %vm728_vm2, %v2249_v62, %v726_v9  ;;  %v855_v9 = vld [vmem:[%s3383_s2 + $0x18] sm:$0xff]  ;;  %v854_v13 = vld [vmem:[%s3383_s2 + $0x10] sm:$0xff] }
 0x140   : > { %vm731_vm3 = vcmp.lt.f32.partialorder %v635_v21, %v729_v24 }
 0x141   : > { %v732_v25 = vsel %vm731_vm3, %v635_v21, %v729_v24  ;;  %v733_v28 = vsel %vm731_vm3, %v2898_v14, %v730_v19  ;;  %v856_v19 = vld [vmem:[%s3383_s2 + $0x20] sm:$0xff]  ;;  %v859_v21 = vld [vmem:[%s3383_s2 + $0x38] sm:$0xff]  ;;  %v858_v24 = vld [vmem:[%s3383_s2 + $0x30] sm:$0xff] }
 0x142   : > { %vm734_vm4 = vcmp.lt.f32.partialorder %v2252_v17, %v732_v25 }
 0x143   : > { %v735_v29 = vsel %vm734_vm4, %v2252_v17, %v732_v25  ;;  %v736_v30 = vsel %vm734_vm4, %v2902_v20, %v733_v28  ;;  %v857_v17 = vld [vmem:[%s3383_s2 + $0x28] sm:$0xff]  ;;  %v1891_v25 = vld [vmem:[%s3382_s1 + $0x100] sm:$0xff] }
 0x144   : > { %v737_v32 = vsel %vm246_vm0, %v735_v29, inf }
 0x145   : > { %v738_v35 = vrot.slane %v737_v32, 4 }
 0x147   : > { %v739_v36 = vmin.f32 %v737_v32, %v738_v35 }
 0x149   : > { %v740_v38 = vrot.slane %v739_v36, 2 }
 0x14b   : > { %v741_v40 = vmin.f32 %v739_v36, %v740_v38 }
 0x14d   : > { %v742_v41 = vrot.slane %v741_v40, 1 }
 0x14f   : > { %v743_v43 = vmin.f32 %v741_v40, %v742_v41 }
 0x151   : > { %vm744_vm5 = vcmp.eq.f32.partialorder %v735_v29, %v743_v43 }
 0x152   : > { %v745_v45 = vsel %vm744_vm5, %v736_v30, 256 }
 0x153   : > { %v746_v47 = vsel %vm246_vm0, %v745_v45, 2147483647 }
 0x154   : > { %v747_v52 = vrot.slane %v746_v47, 4 }
 0x156   : > { %vm748_vm6 = vcmp.lt.s32.totalorder %v746_v47, %v747_v52 }
 0x157   : > { %v749_v55 = vsel %vm748_vm6, %v746_v47, %v747_v52 }
 0x158   : > { %v750_v56 = vrot.slane %v749_v55, 2 }
 0x15a   : > { %vm751_vm7 = vcmp.lt.s32.totalorder %v749_v55, %v750_v56 }
 0x15b   : > { %v752_v57 = vsel %vm751_vm7, %v749_v55, %v750_v56 }
 0x15c   : > { %v753_v62 = vrot.slane %v752_v57, 1 }
 0x15e   : > { %vm754_vm9 = vcmp.lt.s32.totalorder %v752_v57, %v753_v62 }
 0x15f   : > { %v2911_v63 = vsel %vm754_vm9, %v752_v57, %v753_v62 }
 0x160   : > { %vm772_vm10 = vcmp.eq.s32.totalorder %v2842_v48, %v2911_v63  ;;  %vm773_vm11 = vcmp.eq.s32.totalorder %v2846_v54, %v2911_v63  ;;  %vm756_vm12 = vcmp.eq.s32.totalorder %v2779_v46, %v2911_v63  ;;  %vm757_vm13 = vcmp.eq.s32.totalorder %v2782_v49, %v2911_v63  ;;  %958 = vst.msk [vmem:[%s2921_s11] sm:$0x1] %vm957_vm8, %v2911_v63 }
 0x161   : > { %vm2319_vm14 = vmpackc.low %vm773_vm11, %vm772_vm10  ;;  %vm774_vm15 = vcmp.eq.s32.totalorder %v2850_v60, %v2911_v63  ;;  %vm775_vm2 = vcmp.eq.s32.totalorder %v2854_v0, %v2911_v63  ;;  %vm758_vm5 = vcmp.eq.s32.totalorder %v2785_v51, %v2911_v63  ;;  %vm759_vm6 = vcmp.eq.s32.totalorder %v2788_v53, %v2911_v63 }
 0x162   : > { %2320 = vmatprep.subr.msk.bf16.mxu1 %vm2319_vm14, %v2529_v3  ;;  %vm2321_vm3 = vmpackc.low %vm757_vm13, %vm756_vm12  ;;  %vm776_vm7 = vcmp.eq.s32.totalorder %v2858_v11, %v2911_v63  ;;  %vm777_vm9 = vcmp.eq.s32.totalorder %v2862_v16, %v2911_v63  ;;  %vm760_vm12 = vcmp.eq.s32.totalorder %v2794_v58, %v2911_v63  ;;  %vm761_vm13 = vcmp.eq.s32.totalorder %v2798_v61, %v2911_v63 }
 0x163   : > { %2322 = vmatpush3.bf16.msk.msra.mxu1 %vm2321_vm3, %v2529_v3  ;;  %vm2323_vm4 = vmpackc.low %vm775_vm2, %vm774_vm15  ;;  %vm778_vm14 = vcmp.eq.s32.totalorder %v2866_v22, %v2911_v63  ;;  %vm779_vm15 = vcmp.eq.s32.totalorder %v2870_v27, %v2911_v63 }
 0x164   : > { %2324 = vmatprep.subr.msk.bf16.mxu1 %vm2323_vm4, %v2529_v3  ;;  %vm2325_vm10 = vmpackc.low %vm759_vm6, %vm758_vm5  ;;  %vm762_vm4 = vcmp.eq.s32.totalorder %v2802_v2, %v2911_v63  ;;  %vm763_vm5 = vcmp.eq.s32.totalorder %v2806_v5, %v2911_v63  ;;  %vm780_vm6 = vcmp.eq.s32.totalorder %v2874_v33, %v2911_v63 }
 0x165   : > { %vm2327_vm11 = vmpackc.low %vm777_vm9, %vm776_vm7  ;;  %vm781_vm7 = vcmp.eq.s32.totalorder %v2878_v37, %v2911_v63 }
 0x166   : > { %vm2329_vm2 = vmpackc.low %vm761_vm13, %vm760_vm12  ;;  %vm765_vm12 = vcmp.eq.s32.totalorder %v2814_v18, %v2911_v63  ;;  %vm782_vm13 = vcmp.eq.s32.totalorder %v2882_v44, %v2911_v63 }
 0x167   : > { %2326 = vmatpush3.bf16.msk.msra.mxu1 %vm2325_vm10, %v2529_v3  ;;  %vm2331_vm3 = vmpackc.low %vm779_vm15, %vm778_vm14  ;;  %vm783_vm14 = vcmp.eq.s32.totalorder %v2886_v50, %v2911_v63 }
 0x168   : > { %2328 = vmatprep.subr.msk.bf16.mxu1 %vm2327_vm11, %v2529_v3  ;;  %vm2333_vm9 = vmpackc.low %vm763_vm5, %vm762_vm4  ;;  %vm764_vm11 = vcmp.eq.s32.totalorder %v2810_v15, %v2911_v63  ;;  %vm767_vm4 = vcmp.eq.s32.totalorder %v2822_v26, %v2911_v63  ;;  %vm784_vm5 = vcmp.eq.s32.totalorder %v2890_v59, %v2911_v63 }
 0x169   : > { %vm2335_vm10 = vmpackc.low %vm781_vm7, %vm780_vm6  ;;  %vm785_vm6 = vcmp.eq.s32.totalorder %v2894_v1, %v2911_v63 }
 0x16a   : > { %vm2337_vm15 = vmpackc.low %vm765_vm12, %vm764_vm11  ;;  %vm769_vm11 = vcmp.eq.s32.totalorder %v2830_v34, %v2911_v63  ;;  %vm786_vm12 = vcmp.eq.s32.totalorder %v2898_v14, %v2911_v63 }
 0x16b   : > { %2330 = vmatpush3.bf16.msk.msra.mxu1 %vm2329_vm2, %v2529_v3  ;;  %vm2339_vm2 = vmpackc.low %vm783_vm14, %vm782_vm13  ;;  %vm787_vm13 = vcmp.eq.s32.totalorder %v2902_v20, %v2911_v63 }
 0x16c   : > { %2332 = vmatprep.subr.msk.bf16.mxu1 %vm2331_vm3, %v2529_v3  ;;  %vm766_vm3 = vcmp.eq.s32.totalorder %v2818_v23, %v2911_v63 }
 0x16d   : > { %vm2341_vm7 = vmpackc.low %vm767_vm4, %vm766_vm3  ;;  %vm771_vm3 = vcmp.eq.s32.totalorder %v2838_v42, %v2911_v63 }
 0x16f   : > { %2334 = vmatpush3.bf16.msk.msra.mxu1 %vm2333_vm9, %v2529_v3  ;;  %vm2343_vm9 = vmpackc.low %vm785_vm6, %vm784_vm5 }
 0x170   : > { %2336 = vmatprep.subr.msk.bf16.mxu1 %vm2335_vm10, %v2529_v3  ;;  %vm768_vm10 = vcmp.eq.s32.totalorder %v2826_v31, %v2911_v63 }
 0x171   : > { %vm2345_vm14 = vmpackc.low %vm769_vm11, %vm768_vm10 }
 0x173   : > { %2338 = vmatpush3.bf16.msk.msra.mxu1 %vm2337_vm15, %v2529_v3  ;;  %vm2347_vm15 = vmpackc.low %vm787_vm13, %vm786_vm12 }
 0x174   : > { %2340 = vmatprep.subr.msk.bf16.mxu1 %vm2339_vm2, %v2529_v3  ;;  %vm770_vm2 = vcmp.eq.s32.totalorder %v2834_v39, %v2911_v63 }
 0x175   : > { %vm2349_vm4 = vmpackc.low %vm771_vm3, %vm770_vm2 }
 0x177   : > { %2342 = vmatpush3.bf16.msk.msra.mxu1 %vm2341_vm7, %v2529_v3 }
 0x178   : > { %2344 = vmatprep.subr.msk.bf16.mxu1 %vm2343_vm9, %v2529_v3 }
 0x17b   : > { %2346 = vmatpush3.bf16.msk.msra.mxu1 %vm2345_vm14, %v2529_v3 }
 0x17c   : > { %2348 = vmatprep.subr.msk.bf16.mxu1 %vm2347_vm15, %v2529_v3 }
 0x17f   : > { %2350 = vmatpush3.bf16.msk.msra.mxu1 %vm2349_vm4, %v2529_v3 }
 0x182   : > { %925 = vmatmul.mubr.f32.vlgmr.msra.gmra.mrb[0].mxu1 %v852_v4 }
 0x183   : > { %929 = vmatprep.mubr.f32.mxu1 %v855_v9  ;;  %v1893_v9 = vld [vmem:[%s3382_s1 + $0x110] sm:$0xff] }
 0x186   : > { %930 = vmatmul.mubr.f32.gmra.mrb[2].mxu1 %v854_v13  ;;  %v1894_v13 = vld [vmem:[%s3382_s1 + $0x118] sm:$0xff] }
 0x187   : > { %934 = vmatprep.mubr.f32.mxu1 %v857_v17  ;;  %v1895_v17 = vld [vmem:[%s3382_s1 + $0x120] sm:$0xff] }
 0x18a   : > { %935 = vmatmul.mubr.f32.gmra.mrb[4].mxu1 %v856_v19  ;;  %v1897_v19 = vld [vmem:[%s3382_s1 + $0x130] sm:$0xff] }
 0x18b   : > { %939 = vmatprep.mubr.f32.mxu1 %v859_v21  ;;  %v1898_v21 = vld [vmem:[%s3382_s1 + $0x138] sm:$0xff] }
 0x18e   : > { %940 = vmatmul.mubr.f32.gmra.mrb[6].mxu1 %v858_v24  ;;  %v1899_v24 = vld [vmem:[%s3382_s1 + $0x140] sm:$0xff] }
 0x18f   : > { %2263 = vmatprep.mubr.msk.f32.mxu1 %vm322_vm1, %v1891_v25  ;;  %v1900_v25 = vld [vmem:[%s3382_s1 + $0x148] sm:$0xff] }
 0x255   : > { %v2102_v28 = vpop.f32.mrb[0].mxu1 }
 0x256   : > { %v2103_v29 = vpop.f32.mrb[1].mxu1 }
 0x257   : > { %v2104_v30 = vadd.f32 %v2103_v29, %v2102_v28  ;;  %v1901_v28 = vld [vmem:[%s3382_s1 + $0x150] sm:$0xff]  ;;  %v1902_v29 = vld [vmem:[%s3382_s1 + $0x158] sm:$0xff] }
 0x259   : > { %v949_v32 = vsub.f32 %v2636_v6, %v2104_v30  ;;  %v2105_v35 = vpop.f32.mrb[2].mxu1  ;;  %v1903_v30 = vld [vmem:[%s3382_s1 + $0x160] sm:$0xff] }
 0x25a   : > { %v2106_v36 = vpop.f32.mrb[3].mxu1 }
 0x25b   : > { %953 = vst.msk [vmem:[#allocation2] sm:$0xff] %vm246_vm0, %v949_v32  ;;  %v2107_v38 = vadd.f32 %v2106_v36, %v2105_v35  ;;  %v1904_v32 = vld [vmem:[%s3382_s1 + $0x168] sm:$0xff]  ;;  %v1905_v35 = vld [vmem:[%s3382_s1 + $0x170] sm:$0xff]  ;;  %v1906_v36 = vld [vmem:[%s3382_s1 + $0x178] sm:$0xff] }
 0x25d   : > { %v950_v40 = vsub.f32 %v2638_v7, %v2107_v38  ;;  %v2108_v41 = vpop.f32.mrb[4].mxu1  ;;  %v1907_v38 = vld [vmem:[%s3382_s1 + $0x180] sm:$0xff] }
 0x25e   : > { %v2109_v43 = vpop.f32.mrb[5].mxu1 }
 0x25f   : > { %954 = vst.msk [vmem:[#allocation2 + $0x8] sm:$0xff] %vm246_vm0, %v950_v40  ;;  %v2110_v45 = vadd.f32 %v2109_v43, %v2108_v41  ;;  %v1908_v40 = vld [vmem:[%s3382_s1 + $0x188] sm:$0xff]  ;;  %v1909_v41 = vld [vmem:[%s3382_s1 + $0x190] sm:$0xff]  ;;  %v1910_v43 = vld [vmem:[%s3382_s1 + $0x198] sm:$0xff] }
 0x261   : > { %v951_v47 = vsub.f32 %v2640_v8, %v2110_v45  ;;  %v2111_v52 = vpop.f32.mrb[6].mxu1  ;;  %v1911_v45 = vld [vmem:[%s3382_s1 + $0x1a0] sm:$0xff] }
 0x262   : > { %v2112_v55 = vpop.f32.mrb[7].mxu1  ;;  %v3030_v57 = vld [vmem:[#allocation2] sm:$0xff] }
 0x263   : > { %955 = vst.msk [vmem:[#allocation2 + $0x10] sm:$0xff] %vm246_vm0, %v951_v47  ;;  %v2113_v56 = vadd.f32 %v2112_v55, %v2111_v52  ;;  %v1912_v47 = vld [vmem:[%s3382_s1 + $0x1a8] sm:$0xff]  ;;  %v1913_v52 = vld [vmem:[%s3382_s1 + $0x1b0] sm:$0xff]  ;;  %v1914_v55 = vld [vmem:[%s3382_s1 + $0x1b8] sm:$0xff] }
 0x265   : > { %v952_v6 = vsub.f32 %v2644_v10, %v2113_v56  ;;  %v1892_v10 = vld [vmem:[%s3382_s1 + $0x108] sm:$0xff]  ;;  %v1915_v56 = vld [vmem:[%s3382_s1 + $0x1c0] sm:$0xff] }
 0x266   : > { %v3032_v62 = vld [vmem:[#allocation2 + $0x8] sm:$0xff] }
 0x267   : > { %956 = vst.msk [vmem:[#allocation2 + $0x18] sm:$0xff] %vm246_vm0, %v952_v6  ;;  %v2351_v7 = vpack.c.bf16 %v3032_v62, %v3030_v57  ;;  %v1916_v6 = vld [vmem:[%s3382_s1 + $0x1c8] sm:$0xff] }
 0x269   : > { %2352 = vmatprep.subr.bf16.mxu1 %v2351_v7 }
 0x26a   : > { %2354 = vmatpush3.bf16.msra.mxu1 %v2351_v7  ;;  %v3037_v63 = vld [vmem:[#allocation2 + $0x10] sm:$0xff] }
 0x26b   : > { %v1917_v7 = vld [vmem:[%s3382_s1 + $0x1d0] sm:$0xff] }
 0x26e   : > { %v3039_v8 = vld [vmem:[#allocation2 + $0x18] sm:$0xff] }
 0x26f   : > { %v2355_v4 = vpack.c.bf16 %v3039_v8, %v3037_v63 }
 0x271   : > { %2356 = vmatprep.subr.bf16.mxu1 %v2355_v4 }
 0x272   : > { %2358 = vmatpush3.bf16.msra.mxu1 %v2355_v4  ;;  %v1918_v4 = vld [vmem:[%s3382_s1 + $0x1d8] sm:$0xff] }
 0x273   : > { %2261 = vmatprep.subr.mxu1 %v2648_v12 }
 0x276   : > { %2262 = vmatpush3.msra.mxu1 %v2648_v12  ;;  %v1896_v12 = vld [vmem:[%s3382_s1 + $0x128] sm:$0xff] }
 0x277   : > { %2264 = vmatmul.mubr.msk.f32.vlgmr.msra.gmra.mrb[8].mxu1 %vm322_vm1, %v1892_v10  ;;  %v1919_v10 = vld [vmem:[%s3382_s1 + $0x1e0] sm:$0xff] }
 0x278   : > { %2266 = vmatprep.mubr.msk.f32.mxu1 %vm322_vm1, %v1893_v9  ;;  %v1920_v9 = vld [vmem:[%s3382_s1 + $0x1e8] sm:$0xff] }
 0x27b   : > { %2267 = vmatmul.mubr.msk.f32.gmra.mrb[10].mxu1 %vm322_vm1, %v1894_v13  ;;  %v1921_v13 = vld [vmem:[%s3382_s1 + $0x1f0] sm:$0xff] }
 0x27c   : > { %2269 = vmatprep.mubr.msk.f32.mxu1 %vm322_vm1, %v1895_v17  ;;  %v1922_v17 = vld [vmem:[%s3382_s1 + $0x1f8] sm:$0xff] }
 0x27f   : > { %2270 = vmatmul.mubr.msk.f32.gmra.mrb[12].mxu1 %vm322_vm1, %v1896_v12  ;;  %v1988_v12 = vld [vmem:[%s3383_s2 + $0x48] sm:$0xff] }
 0x280   : > { %2272 = vmatprep.mubr.msk.f32.mxu1 %vm322_vm1, %v1897_v19  ;;  %1599 = vmatprep.mubr.f32.mxu0 %v1988_v12 }
 0x283   : > { %2273 = vmatmul.mubr.msk.f32.gmra.mrb[14].mxu1 %vm322_vm1, %v1898_v21 }
 0x284   : > { %2275 = vmatprep.mubr.msk.f32.mxu1 %vm322_vm1, %v1899_v24 }
 0x287   : > { %2276 = vmatmul.mubr.msk.f32.gmra.mrb[16].mxu1 %vm322_vm1, %v1900_v25 }
 0x288   : > { %2278 = vmatprep.mubr.msk.f32.mxu1 %vm322_vm1, %v1901_v28 }
 0x28b   : > { %2279 = vmatmul.mubr.msk.f32.gmra.mrb[18].mxu1 %vm322_vm1, %v1902_v29 }
 0x28c   : > { %2281 = vmatprep.mubr.msk.f32.mxu1 %vm322_vm1, %v1903_v30 }
 0x28f   : > { %2282 = vmatmul.mubr.msk.f32.gmra.mrb[20].mxu1 %vm322_vm1, %v1904_v32 }
 0x290   : > { %2284 = vmatprep.mubr.msk.f32.mxu1 %vm322_vm1, %v1905_v35 }
 0x293   : > { %2285 = vmatmul.mubr.msk.f32.gmra.mrb[22].mxu1 %vm322_vm1, %v1906_v36 }
 0x294   : > { %2287 = vmatprep.mubr.msk.f32.mxu1 %vm322_vm1, %v1907_v38 }
 0x297   : > { %2288 = vmatmul.mubr.msk.f32.gmra.mrb[24].mxu1 %vm322_vm1, %v1908_v40 }
 0x298   : > { %2290 = vmatprep.mubr.msk.f32.mxu1 %vm322_vm1, %v1909_v41 }
 0x29b   : > { %2291 = vmatmul.mubr.msk.f32.gmra.mrb[26].mxu1 %vm322_vm1, %v1910_v43 }
 0x29c   : > { %2293 = vmatprep.mubr.msk.f32.mxu1 %vm322_vm1, %v1911_v45 }
 0x29f   : > { %2294 = vmatmul.mubr.msk.f32.gmra.mrb[28].mxu1 %vm322_vm1, %v1912_v47 }
 0x2a0   : > { %2296 = vmatprep.mubr.msk.f32.mxu1 %vm322_vm1, %v1913_v52 }
 0x2a3   : > { %2297 = vmatmul.mubr.msk.f32.gmra.mrb[30].mxu1 %vm322_vm1, %v1914_v55 }
 0x2a4   : > { %2299 = vmatprep.mubr.msk.f32.mxu1 %vm322_vm1, %v1915_v56 }
 0x2a7   : > { %2300 = vmatmul.mubr.msk.f32.gmra.mrb[32].mxu1 %vm322_vm1, %v1916_v6 }
 0x2a8   : > { %2302 = vmatprep.mubr.msk.f32.mxu1 %vm322_vm1, %v1917_v7 }
 0x2ab   : > { %2303 = vmatmul.mubr.msk.f32.gmra.mrb[34].mxu1 %vm322_vm1, %v1918_v4 }
 0x2ac   : > { %2305 = vmatprep.mubr.msk.f32.mxu1 %vm322_vm1, %v1919_v10 }
 0x2af   : > { %2306 = vmatmul.mubr.msk.f32.gmra.mrb[36].mxu1 %vm322_vm1, %v1920_v9 }
 0x2b0   : > { %2308 = vmatprep.mubr.msk.f32.mxu1 %vm322_vm1, %v1921_v13 }
 0x2b3   : > { %2309 = vmatmul.mubr.msk.f32.gmra.mrb[38].mxu1 %vm322_vm1, %v1922_v17 }
 0x34a   : > { %v2265_v19 = vpop.f32.mrb[8].mxu1 }
 0x34b   : > { %v1159_v21 = vpop.f32.mrb[9].mxu1 }
 0x34c   : > { %vm1318_vm5 = vcmp.lt.f32.partialorder %v2265_v19, %v1159_v21 }
 0x34d   : > { %v1319_v24 = vsel %vm1318_vm5, %v2265_v19, %v1159_v21  ;;  %v1320_v29 = vsel %vm1318_vm5, %v2782_v49, %v2779_v46 }
 0x34e   : > { %v2268_v25 = vpop.f32.mrb[10].mxu1 }
 0x34f   : > { %v1169_v28 = vpop.f32.mrb[11].mxu1 }
 0x350   : > { %vm1321_vm6 = vcmp.lt.f32.partialorder %v1169_v28, %v1319_v24 }
 0x351   : > { %v1322_v30 = vsel %vm1321_vm6, %v1169_v28, %v1319_v24  ;;  %v1323_v32 = vsel %vm1321_vm6, %v2785_v51, %v1320_v29 }
 0x352   : > { %vm1324_vm7 = vcmp.lt.f32.partialorder %v2268_v25, %v1322_v30  ;;  %v2271_v35 = vpop.f32.mrb[12].mxu1 }
 0x353   : > { %v1326_v36 = vsel %vm1324_vm7, %v2788_v53, %v1323_v32  ;;  %v1179_v38 = vpop.f32.mrb[13].mxu1  ;;  %v1325_v40 = vsel %vm1324_vm7, %v2268_v25, %v1322_v30 }
 0x354   : > { %vm1327_vm1 = vcmp.lt.f32.partialorder %v1179_v38, %v1325_v40 }
 0x355   : > { %v1328_v41 = vsel %vm1327_vm1, %v1179_v38, %v1325_v40  ;;  %v1329_v43 = vsel %vm1327_vm1, %v2794_v58, %v1326_v36 }
 0x356   : > { %vm1330_vm9 = vcmp.lt.f32.partialorder %v2271_v35, %v1328_v41  ;;  %v2274_v45 = vpop.f32.mrb[14].mxu1 }
 0x357   : > { %v1332_v47 = vsel %vm1330_vm9, %v2798_v61, %v1329_v43  ;;  %v1189_v52 = vpop.f32.mrb[15].mxu1  ;;  %v1331_v55 = vsel %vm1330_vm9, %v2271_v35, %v1328_v41 }
 0x358   : > { %vm1333_vm10 = vcmp.lt.f32.partialorder %v1189_v52, %v1331_v55 }
 0x359   : > { %v1334_v56 = vsel %vm1333_vm10, %v1189_v52, %v1331_v55  ;;  %v1335_v6 = vsel %vm1333_vm10, %v2802_v2, %v1332_v47 }
 0x35a   : > { %vm1336_vm11 = vcmp.lt.f32.partialorder %v2274_v45, %v1334_v56  ;;  %v2277_v7 = vpop.f32.mrb[16].mxu1 }
 0x35b   : > { %v1338_v4 = vsel %vm1336_vm11, %v2806_v5, %v1335_v6  ;;  %v1199_v10 = vpop.f32.mrb[17].mxu1  ;;  %v1337_v9 = vsel %vm1336_vm11, %v2274_v45, %v1334_v56 }
 0x35c   : > { %vm1339_vm12 = vcmp.lt.f32.partialorder %v1199_v10, %v1337_v9 }
 0x35d   : > { %v1340_v13 = vsel %vm1339_vm12, %v1199_v10, %v1337_v9  ;;  %v1341_v17 = vsel %vm1339_vm12, %v2810_v15, %v1338_v4 }
 0x35e   : > { %vm1342_vm13 = vcmp.lt.f32.partialorder %v2277_v7, %v1340_v13  ;;  %v2280_v12 = vpop.f32.mrb[18].mxu1 }
 0x35f   : > { %v1344_v19 = vsel %vm1342_vm13, %v2814_v18, %v1341_v17  ;;  %v1209_v21 = vpop.f32.mrb[19].mxu1  ;;  %v1343_v24 = vsel %vm1342_vm13, %v2277_v7, %v1340_v13 }
 0x360   : > { %vm1345_vm14 = vcmp.lt.f32.partialorder %v1209_v21, %v1343_v24 }
 0x361   : > { %v1346_v25 = vsel %vm1345_vm14, %v1209_v21, %v1343_v24  ;;  %v1347_v28 = vsel %vm1345_vm14, %v2818_v23, %v1344_v19 }
 0x362   : > { %vm1348_vm15 = vcmp.lt.f32.partialorder %v2280_v12, %v1346_v25  ;;  %v2283_v29 = vpop.f32.mrb[20].mxu1 }
 0x363   : > { %v1350_v30 = vsel %vm1348_vm15, %v2822_v26, %v1347_v28  ;;  %v1219_v32 = vpop.f32.mrb[21].mxu1  ;;  %v1349_v35 = vsel %vm1348_vm15, %v2280_v12, %v1346_v25 }
 0x364   : > { %vm1351_vm2 = vcmp.lt.f32.partialorder %v1219_v32, %v1349_v35 }
 0x365   : > { %v1352_v36 = vsel %vm1351_vm2, %v1219_v32, %v1349_v35  ;;  %v1353_v38 = vsel %vm1351_vm2, %v2826_v31, %v1350_v30 }
 0x366   : > { %vm1354_vm3 = vcmp.lt.f32.partialorder %v2283_v29, %v1352_v36  ;;  %v2286_v40 = vpop.f32.mrb[22].mxu1 }
 0x367   : > { %v1356_v41 = vsel %vm1354_vm3, %v2830_v34, %v1353_v38  ;;  %v1229_v43 = vpop.f32.mrb[23].mxu1  ;;  %v1355_v45 = vsel %vm1354_vm3, %v2283_v29, %v1352_v36 }
 0x368   : > { %vm1357_vm4 = vcmp.lt.f32.partialorder %v1229_v43, %v1355_v45 }
 0x369   : > { %v1358_v47 = vsel %vm1357_vm4, %v1229_v43, %v1355_v45  ;;  %v1359_v52 = vsel %vm1357_vm4, %v2834_v39, %v1356_v41 }
 0x36a   : > { %vm1360_vm5 = vcmp.lt.f32.partialorder %v2286_v40, %v1358_v47  ;;  %v2289_v55 = vpop.f32.mrb[24].mxu1 }
 0x36b   : > { %v1362_v56 = vsel %vm1360_vm5, %v2838_v42, %v1359_v52  ;;  %v1239_v6 = vpop.f32.mrb[25].mxu1  ;;  %v1361_v7 = vsel %vm1360_vm5, %v2286_v40, %v1358_v47 }
 0x36c   : > { %vm1363_vm6 = vcmp.lt.f32.partialorder %v1239_v6, %v1361_v7 }
 0x36d   : > { %v1364_v4 = vsel %vm1363_vm6, %v1239_v6, %v1361_v7  ;;  %v1365_v10 = vsel %vm1363_vm6, %v2842_v48, %v1362_v56 }
 0x36e   : > { %vm1366_vm7 = vcmp.lt.f32.partialorder %v2289_v55, %v1364_v4  ;;  %v2292_v9 = vpop.f32.mrb[26].mxu1 }
 0x36f   : > { %v1368_v13 = vsel %vm1366_vm7, %v2846_v54, %v1365_v10  ;;  %v1249_v17 = vpop.f32.mrb[27].mxu1  ;;  %v1367_v12 = vsel %vm1366_vm7, %v2289_v55, %v1364_v4 }
 0x370   : > { %vm1369_vm1 = vcmp.lt.f32.partialorder %v1249_v17, %v1367_v12 }
 0x371   : > { %v1370_v19 = vsel %vm1369_vm1, %v1249_v17, %v1367_v12  ;;  %v1371_v21 = vsel %vm1369_vm1, %v2850_v60, %v1368_v13 }
 0x372   : > { %vm1372_vm9 = vcmp.lt.f32.partialorder %v2292_v9, %v1370_v19  ;;  %v2295_v24 = vpop.f32.mrb[28].mxu1 }
 0x373   : > { %v1374_v25 = vsel %vm1372_vm9, %v2854_v0, %v1371_v21  ;;  %v1259_v28 = vpop.f32.mrb[29].mxu1  ;;  %v1373_v29 = vsel %vm1372_vm9, %v2292_v9, %v1370_v19 }
 0x374   : > { %vm1375_vm10 = vcmp.lt.f32.partialorder %v1259_v28, %v1373_v29 }
 0x375   : > { %v1376_v30 = vsel %vm1375_vm10, %v1259_v28, %v1373_v29  ;;  %v1377_v32 = vsel %vm1375_vm10, %v2858_v11, %v1374_v25 }
 0x376   : > { %vm1378_vm11 = vcmp.lt.f32.partialorder %v2295_v24, %v1376_v30  ;;  %v2298_v35 = vpop.f32.mrb[30].mxu1 }
 0x377   : > { %v1380_v36 = vsel %vm1378_vm11, %v2862_v16, %v1377_v32  ;;  %v1269_v38 = vpop.f32.mrb[31].mxu1  ;;  %v1379_v40 = vsel %vm1378_vm11, %v2295_v24, %v1376_v30 }
 0x378   : > { %vm1381_vm12 = vcmp.lt.f32.partialorder %v1269_v38, %v1379_v40 }
 0x379   : > { %v1382_v41 = vsel %vm1381_vm12, %v1269_v38, %v1379_v40  ;;  %v1383_v43 = vsel %vm1381_vm12, %v2866_v22, %v1380_v36 }
 0x37a   : > { %vm1384_vm13 = vcmp.lt.f32.partialorder %v2298_v35, %v1382_v41  ;;  %v2301_v45 = vpop.f32.mrb[32].mxu1 }
 0x37b   : > { %v1386_v47 = vsel %vm1384_vm13, %v2870_v27, %v1383_v43  ;;  %v1279_v52 = vpop.f32.mrb[33].mxu1  ;;  %v1385_v55 = vsel %vm1384_vm13, %v2298_v35, %v1382_v41 }
 0x37c   : > { %vm1387_vm14 = vcmp.lt.f32.partialorder %v1279_v52, %v1385_v55 }
 0x37d   : > { %v1388_v56 = vsel %vm1387_vm14, %v1279_v52, %v1385_v55  ;;  %v1389_v6 = vsel %vm1387_vm14, %v2874_v33, %v1386_v47 }
 0x37e   : > { %vm1390_vm15 = vcmp.lt.f32.partialorder %v2301_v45, %v1388_v56  ;;  %v2304_v7 = vpop.f32.mrb[34].mxu1 }
 0x37f   : > { %v1392_v4 = vsel %vm1390_vm15, %v2878_v37, %v1389_v6  ;;  %v1289_v10 = vpop.f32.mrb[35].mxu1  ;;  %v1391_v9 = vsel %vm1390_vm15, %v2301_v45, %v1388_v56 }
 0x380   : > { %vm1393_vm2 = vcmp.lt.f32.partialorder %v1289_v10, %v1391_v9 }
 0x381   : > { %v1394_v13 = vsel %vm1393_vm2, %v1289_v10, %v1391_v9  ;;  %v1395_v17 = vsel %vm1393_vm2, %v2882_v44, %v1392_v4 }
 0x382   : > { %vm1396_vm3 = vcmp.lt.f32.partialorder %v2304_v7, %v1394_v13  ;;  %v2307_v12 = vpop.f32.mrb[36].mxu1 }
 0x383   : > { %v1398_v19 = vsel %vm1396_vm3, %v2886_v50, %v1395_v17  ;;  %v1299_v21 = vpop.f32.mrb[37].mxu1  ;;  %v1397_v24 = vsel %vm1396_vm3, %v2304_v7, %v1394_v13 }
 0x384   : > { %vm1399_vm4 = vcmp.lt.f32.partialorder %v1299_v21, %v1397_v24 }
 0x385   : > { %v1400_v25 = vsel %vm1399_vm4, %v1299_v21, %v1397_v24  ;;  %v1401_v28 = vsel %vm1399_vm4, %v2890_v59, %v1398_v19 }
 0x386   : > { %vm1402_vm5 = vcmp.lt.f32.partialorder %v2307_v12, %v1400_v25  ;;  %v2310_v29 = vpop.f32.mrb[38].mxu1 }
 0x387   : > { %v1309_v30 = vpop.f32.mrb[39].mxu1  ;;  %v1403_v32 = vsel %vm1402_vm5, %v2307_v12, %v1400_v25  ;;  %v1404_v35 = vsel %vm1402_vm5, %v2894_v1, %v1401_v28 }
 0x388   : > { %vm1405_vm6 = vcmp.lt.f32.partialorder %v1309_v30, %v1403_v32 }
 0x389   : > { %v1406_v36 = vsel %vm1405_vm6, %v1309_v30, %v1403_v32  ;;  %v1407_v38 = vsel %vm1405_vm6, %v2898_v14, %v1404_v35 }
 0x38a   : > { %vm1408_vm7 = vcmp.lt.f32.partialorder %v2310_v29, %v1406_v36 }
 0x38b   : > { %v1409_v40 = vsel %vm1408_vm7, %v2310_v29, %v1406_v36  ;;  %v1410_v41 = vsel %vm1408_vm7, %v2902_v20, %v1407_v38 }
 0x38c   : > { %v1411_v43 = vsel %vm246_vm0, %v1409_v40, inf }
 0x38d   : > { %v1412_v45 = vrot.slane %v1411_v43, 4 }
 0x38f   : > { %v1413_v47 = vmin.f32 %v1411_v43, %v1412_v45 }
 0x391   : > { %v1414_v52 = vrot.slane %v1413_v47, 2 }
 0x393   : > { %v1415_v55 = vmin.f32 %v1413_v47, %v1414_v52 }
 0x395   : > { %v1416_v56 = vrot.slane %v1415_v55, 1 }
 0x397   : > { %v1417_v6 = vmin.f32 %v1415_v55, %v1416_v56 }
 0x399   : > { %vm1418_vm1 = vcmp.eq.f32.partialorder %v1409_v40, %v1417_v6 }
 0x39a   : > { %v1419_v7 = vsel %vm1418_vm1, %v1410_v41, 256 }
 0x39b   : > { %v1420_v4 = vsel %vm246_vm0, %v1419_v7, 2147483647 }
 0x39c   : > { %v1421_v10 = vrot.slane %v1420_v4, 4 }
 0x39e   : > { %vm1422_vm9 = vcmp.lt.s32.totalorder %v1420_v4, %v1421_v10 }
 0x39f   : > { %v1423_v9 = vsel %vm1422_vm9, %v1420_v4, %v1421_v10 }
 0x3a0   : > { %v1424_v13 = vrot.slane %v1423_v9, 2 }
 0x3a2   : > { %vm1425_vm10 = vcmp.lt.s32.totalorder %v1423_v9, %v1424_v13 }
 0x3a3   : > { %v1426_v17 = vsel %vm1425_vm10, %v1423_v9, %v1424_v13 }
 0x3a4   : > { %v1427_v12 = vrot.slane %v1426_v17, 1 }
 0x3a6   : > { %vm1428_vm11 = vcmp.lt.s32.totalorder %v1426_v17, %v1427_v12 }
 0x3a7   : > { %v3206_v19 = vsel %vm1428_vm11, %v1426_v17, %v1427_v12 }
 0x3a8   : > { %vm1446_vm12 = vcmp.eq.s32.totalorder %v2842_v48, %v3206_v19  ;;  %vm1447_vm13 = vcmp.eq.s32.totalorder %v2846_v54, %v3206_v19  ;;  %vm1430_vm14 = vcmp.eq.s32.totalorder %v2779_v46, %v3206_v19  ;;  %vm1431_vm15 = vcmp.eq.s32.totalorder %v2782_v49, %v3206_v19  ;;  %1632 = vst.msk [vmem:[%s2921_s11 + $0x1] sm:$0x1] %vm957_vm8, %v3206_v19  ;;  %v1987_v46 = vld [vmem:[%s3383_s2 + $0x40] sm:$0xff]  ;;  %v1990_v49 = vld [vmem:[%s3383_s2 + $0x58] sm:$0xff] }
 0x3a9   : > { %vm2359_vm2 = vmpackc.low %vm1447_vm13, %vm1446_vm12  ;;  %vm1448_vm3 = vcmp.eq.s32.totalorder %v2850_v60, %v3206_v19  ;;  %vm1449_vm4 = vcmp.eq.s32.totalorder %v2854_v0, %v3206_v19  ;;  %vm1432_vm7 = vcmp.eq.s32.totalorder %v2785_v51, %v3206_v19  ;;  %vm1433_vm1 = vcmp.eq.s32.totalorder %v2788_v53, %v3206_v19  ;;  %v1989_v51 = vld [vmem:[%s3383_s2 + $0x50] sm:$0xff]  ;;  %v1992_v53 = vld [vmem:[%s3383_s2 + $0x68] sm:$0xff] }
 0x3aa   : > { %2360 = vmatprep.subr.msk.bf16.mxu0 %vm2359_vm2, %v2529_v3  ;;  %vm2361_vm5 = vmpackc.low %vm1431_vm15, %vm1430_vm14  ;;  %vm1450_vm8 = vcmp.eq.s32.totalorder %v2858_v11, %v3206_v19  ;;  %vm1451_vm9 = vcmp.eq.s32.totalorder %v2862_v16, %v3206_v19  ;;  %vm1434_vm12 = vcmp.eq.s32.totalorder %v2794_v58, %v3206_v19  ;;  %vm1435_vm13 = vcmp.eq.s32.totalorder %v2798_v61, %v3206_v19  ;;  %v1991_v58 = vld [vmem:[%s3383_s2 + $0x60] sm:$0xff]  ;;  %v1994_v61 = vld [vmem:[%s3383_s2 + $0x78] sm:$0xff] }
 0x3ab   : > { %2362 = vmatpush3.bf16.msk.msra.mxu0 %vm2361_vm5, %v2529_v3  ;;  %vm2363_vm6 = vmpackc.low %vm1449_vm4, %vm1448_vm3  ;;  %vm1452_vm14 = vcmp.eq.s32.totalorder %v2866_v22, %v3206_v19  ;;  %vm1453_vm15 = vcmp.eq.s32.totalorder %v2870_v27, %v3206_v19  ;;  %vm1436_vm4 = vcmp.eq.s32.totalorder %v2802_v2, %v3206_v19  ;;  %vm1437_vm5 = vcmp.eq.s32.totalorder %v2806_v5, %v3206_v19  ;;  %v1993_v2 = vld [vmem:[%s3383_s2 + $0x70] sm:$0xff] }
 0x3ac   : > { %2364 = vmatprep.subr.msk.bf16.mxu0 %vm2363_vm6, %v2529_v3  ;;  %vm2365_vm10 = vmpackc.low %vm1433_vm1, %vm1432_vm7  ;;  %vm1454_vm6 = vcmp.eq.s32.totalorder %v2874_v33, %v3206_v19  ;;  %vm1455_vm7 = vcmp.eq.s32.totalorder %v2878_v37, %v3206_v19 }
 0x3ad   : > { %vm2367_vm11 = vmpackc.low %vm1451_vm9, %vm1450_vm8  ;;  %vm1438_vm9 = vcmp.eq.s32.totalorder %v2810_v15, %v3206_v19 }
 0x3ae   : > { %vm2369_vm2 = vmpackc.low %vm1435_vm13, %vm1434_vm12  ;;  %vm1457_vm12 = vcmp.eq.s32.totalorder %v2886_v50, %v3206_v19 }
 0x3af   : > { %2366 = vmatpush3.bf16.msk.msra.mxu0 %vm2365_vm10, %v2529_v3  ;;  %vm2371_vm3 = vmpackc.low %vm1453_vm15, %vm1452_vm14  ;;  %vm1439_vm10 = vcmp.eq.s32.totalorder %v2814_v18, %v3206_v19  ;;  %vm1440_vm15 = vcmp.eq.s32.totalorder %v2818_v23, %v3206_v19 }
 0x3b0   : > { %2368 = vmatprep.subr.msk.bf16.mxu0 %vm2367_vm11, %v2529_v3  ;;  %vm2373_vm1 = vmpackc.low %vm1437_vm5, %vm1436_vm4  ;;  %vm1456_vm11 = vcmp.eq.s32.totalorder %v2882_v44, %v3206_v19  ;;  %vm1459_vm4 = vcmp.eq.s32.totalorder %v2894_v1, %v3206_v19 }
 0x3b1   : > { %vm2375_vm8 = vmpackc.low %vm1455_vm7, %vm1454_vm6  ;;  %vm1442_vm7 = vcmp.eq.s32.totalorder %v2826_v31, %v3206_v19 }
 0x3b2   : > { %vm2377_vm13 = vmpackc.low %vm1439_vm10, %vm1438_vm9  ;;  %vm1461_vm9 = vcmp.eq.s32.totalorder %v2902_v20, %v3206_v19 }
 0x3b3   : > { %2370 = vmatpush3.bf16.msk.msra.mxu0 %vm2369_vm2, %v2529_v3  ;;  %vm2379_vm14 = vmpackc.low %vm1457_vm12, %vm1456_vm11  ;;  %vm1441_vm2 = vcmp.eq.s32.totalorder %v2822_v26, %v3206_v19  ;;  %vm1444_vm12 = vcmp.eq.s32.totalorder %v2834_v39, %v3206_v19 }
 0x3b4   : > { %2372 = vmatprep.subr.msk.bf16.mxu0 %vm2371_vm3, %v2529_v3  ;;  %vm1458_vm3 = vcmp.eq.s32.totalorder %v2890_v59, %v3206_v19  ;;  %vm2381_vm5 = vmpackc.low %vm1441_vm2, %vm1440_vm15 }
 0x3b5   : > { %vm2383_vm6 = vmpackc.low %vm1459_vm4, %vm1458_vm3 }
 0x3b7   : > { %2374 = vmatpush3.bf16.msk.msra.mxu0 %vm2373_vm1, %v2529_v3  ;;  %vm1443_vm1 = vcmp.eq.s32.totalorder %v2830_v34, %v3206_v19 }
 0x3b8   : > { %2376 = vmatprep.subr.msk.bf16.mxu0 %vm2375_vm8, %v2529_v3  ;;  %vm1460_vm8 = vcmp.eq.s32.totalorder %v2898_v14, %v3206_v19  ;;  %vm2385_vm10 = vmpackc.low %vm1443_vm1, %vm1442_vm7 }
 0x3b9   : > { %vm2387_vm11 = vmpackc.low %vm1461_vm9, %vm1460_vm8 }
 0x3bb   : > { %2378 = vmatpush3.bf16.msk.msra.mxu0 %vm2377_vm13, %v2529_v3  ;;  %vm1445_vm13 = vcmp.eq.s32.totalorder %v2838_v42, %v3206_v19 }
 0x3bc   : > { %2380 = vmatprep.subr.msk.bf16.mxu0 %vm2379_vm14, %v2529_v3  ;;  %vm2389_vm14 = vmpackc.low %vm1445_vm13, %vm1444_vm12 }
 0x3bf   : > { %2382 = vmatpush3.bf16.msk.msra.mxu0 %vm2381_vm5, %v2529_v3 }
 0x3c0   : > { %2384 = vmatprep.subr.msk.bf16.mxu0 %vm2383_vm6, %v2529_v3 }
 0x3c3   : > { %2386 = vmatpush3.bf16.msk.msra.mxu0 %vm2385_vm10, %v2529_v3 }
 0x3c4   : > { %2388 = vmatprep.subr.msk.bf16.mxu0 %vm2387_vm11, %v2529_v3 }
 0x3c7   : > { %2390 = vmatpush3.bf16.msk.msra.mxu0 %vm2389_vm14, %v2529_v3 }
 0x3ca   : > { %1600 = vmatmul.mubr.f32.vlgmr.msra.gmra.mrb[32].mxu0 %v1987_v46 }
 0x3cb   : > { %1604 = vmatprep.mubr.f32.mxu0 %v1990_v49 }
 0x3ce   : > { %1605 = vmatmul.mubr.f32.gmra.mrb[34].mxu0 %v1989_v51 }
 0x3cf   : > { %1609 = vmatprep.mubr.f32.mxu0 %v1992_v53 }
 0x3d2   : > { %1610 = vmatmul.mubr.f32.gmra.mrb[36].mxu0 %v1991_v58 }
 0x3d3   : > { %1614 = vmatprep.mubr.f32.mxu0 %v1994_v61 }
 0x3d6   : > { %1615 = vmatmul.mubr.f32.gmra.mrb[38].mxu0 %v1993_v2 }
 0x3d7   : > { %2461 = shalt.err (!%p2458_p5)
}
 0x3d8   : > { %s2462_s18 = scalar_lea.hbm %s3316_s7, 32  ;;  %s2466_s24 = scalar_lea.hbm %s3385_s4, 64 }
 0x3d9   : > { %p2463_p6 = scmp.ne.s32.totalorder %s3316_s7, %s2462_s18  ;;  %p2467_p10 = scmp.lt.u32.totalorder %s3316_s7, %s3385_s4 }
 0x3da   : > { %p2468_p11 = scmp.lt.u32.totalorder %s2466_s24, %s2462_s18  ;;  %p2470_p13 = scmp.lt.u32.totalorder %s2462_s18, %s3316_s7 }
 0x3db   : > { %p2464_p7 = pnand %p2463_p6, %p2596_p4 }
 0x3dc   : > { %p2469_p12 = por %p2468_p11, %p2467_p10 }
 0x3dd   : > { %p2465_p9 = pneg %p2464_p7 }
 0x3de   : > { %p2471_p0 = por %p2470_p13, %p2469_p12 }
 0x3e0   : > { %p2472_p1 = pnand %p2471_p0, %p2465_p9 }
 0x3e2   : > { %2475 = shalt.err (!%p2472_p1)
}
 0x3e3   : > { %2391 = dma.vmem_to_hbm [thread:$0]  (%p2596_p4), %s1676_s10, 32, %s3316_s7, %s1658_s12   ;;  %v1633_v60 = vld [vmem:[%s2626_s9] sm:$0xff]  ;;  %v1634_v37 = vld [vmem:[%s2626_s9 + $0x8] sm:$0xff]  ;;  %v1635_v1 = vld [vmem:[%s2626_s9 + $0x10] sm:$0xff] }
 0x3e4   : > { %s241_s7 = scalar_lea.vmem %s3384_s3, %s2031_s6  ;;  %v1636_v3 = vld [vmem:[%s2626_s9 + $0x18] sm:$0xff] }
 0x49d   : > { %v2183_v5 = vpop.f32.mrb[32].mxu0 }
 0x49e   : > { %v2184_v15 = vpop.f32.mrb[33].mxu0 }
 0x49f   : > { %v2185_v18 = vadd.f32 %v2184_v15, %v2183_v5 }
 0x4a1   : > { %v1624_v23 = vsub.f32 %v3030_v57, %v2185_v18  ;;  %v2186_v26 = vpop.f32.mrb[34].mxu0 }
 0x4a2   : > { %v2187_v31 = vpop.f32.mrb[35].mxu0 }
 0x4a3   : > { %1628 = vst.msk [vmem:[#allocation2] sm:$0xff] %vm246_vm0, %v1624_v23  ;;  %v2188_v34 = vadd.f32 %v2187_v31, %v2186_v26 }
 0x4a5   : > { %v1625_v39 = vsub.f32 %v3032_v62, %v2188_v34  ;;  %v2189_v42 = vpop.f32.mrb[36].mxu0 }
 0x4a6   : > { %v2190_v48 = vpop.f32.mrb[37].mxu0 }
 0x4a7   : > { %1629 = vst.msk [vmem:[#allocation2 + $0x8] sm:$0xff] %vm246_vm0, %v1625_v39  ;;  %v2191_v54 = vadd.f32 %v2190_v48, %v2189_v42 }
 0x4a9   : > { %v1626_v0 = vsub.f32 %v3037_v63, %v2191_v54  ;;  %v2192_v11 = vpop.f32.mrb[38].mxu0 }
 0x4aa   : > { %v1637_v16 = vld [vmem:[#allocation2] sm:$0xff]  ;;  %v2193_v22 = vpop.f32.mrb[39].mxu0 }
 0x4ab   : > { %v1641_v27 = vsub.f32 %v1633_v60, %v1637_v16  ;;  %1630 = vst.msk [vmem:[#allocation2 + $0x10] sm:$0xff] %vm246_vm0, %v1626_v0  ;;  %v2194_v33 = vadd.f32 %v2193_v22, %v2192_v11 }
 0x4ad   : > { %1645 = vst.msk [vmem:[%s241_s7] sm:$0xff] %vm246_vm0, %v1641_v27  ;;  %v1627_v44 = vsub.f32 %v3039_v8, %v2194_v33 }
 0x4ae   : > { %v1638_v50 = vld [vmem:[#allocation2 + $0x8] sm:$0xff] }
 0x4af   : > { %v1642_v59 = vsub.f32 %v1634_v37, %v1638_v50  ;;  %1631 = vst.msk [vmem:[#allocation2 + $0x18] sm:$0xff] %vm246_vm0, %v1627_v44 }
 0x4b1   : > { %1646 = vst.msk [vmem:[%s241_s7 + $0x8] sm:$0xff] %vm246_vm0, %v1642_v59 }
 0x4b2   : > { %v1639_v14 = vld [vmem:[#allocation2 + $0x10] sm:$0xff] }
 0x4b3   : > { %v1643_v20 = vsub.f32 %v1635_v1, %v1639_v14 }
 0x4b5   : > { %1647 = vst.msk [vmem:[%s241_s7 + $0x10] sm:$0xff] %vm246_vm0, %v1643_v20 }
 0x4b6   : > { %v1640_v57 = vld [vmem:[#allocation2 + $0x18] sm:$0xff] }
 0x4b7   : > { %v1644_v62 = vsub.f32 %v1636_v3, %v1640_v57 }
 0x4b9   : > { %1648 = vst.msk [vmem:[%s241_s7 + $0x18] sm:$0xff] %vm246_vm0, %v1644_v62 }
 0x4ba PF: > { %p2397_p4 = scmp.ge.s32.totalorder %s2526_s20, 2  ;;  %s1698_s5 = sand.u32 1, %s2506_s15  }
 0x4bb   : > { %s1699_s6 = scalar_lea.sflag [#allocation4], %s1698_s5 }
 0x4bc   : > { %p2394_p2 = pnand %p2397_p4, %p2603_p8 }
 0x4be   : > { %2501 = dma.done.wait (!%p2394_p2), %s1699_s6, 32  }
 0x4bf   : > { %2503 = vsyncadd (!%p2394_p2), %s1699_s6, 4294967264  ;;  %s18_s20 = sadd.s32 1, %s2526_s20   ;;  %s3388_s15 = smov %s2510_s16 }
 0x4c0   : > { %p15_p3 = scmp.ge.s32.totalorder %s18_s20, 4   ;;  %s3389_s16 = smov %s2514_s17 }
 0x4c1   : > { %s3390_s17 = smov %s2609_s28  ;;  %s3391_s18 = smov %s2522_s19 }
 0x4c2   : > { %s3392_s19 = smov %s3394_s23  ;;  %17 = sbr.rel (!%p15_p3) target bundleno = 4 (0x4), region = 81 }
 0x4c9   :  { %1704 = vsyncpa [#allocation4], 1 }
 0x4ca   :  { %1706 = vsyncpa [#allocation4 + $0x1], 1 }

</bundles_post_ra>
